<compile_context>
chip_gen: v5e
topology: v5e:2x2
jax: 0.10.0
libtpu: 0.0.40
codegen_flags: <defaults>
</compile_context>

<pallas_src>
import numpy as np
import jax
import jax.numpy as jnp
from jax import lax
from jax.experimental import pallas as pl
from jax.experimental.pallas import tpu as pltpu

LANE = 128
SUBLANE = 8


def _round_up(x, m):
    return (x + m - 1) // m * m


def _cdiv(a, b):
    return -(-a // b)


def _make_lstm_kernel(*, Hp, TT, last_chunk_steps, unroll):
    """Build the per-chunk LSTM kernel; static config is closed over."""

    def _sigmoid(x):
        # Single EUP op (tanh) instead of exp + divide on the serial path.
        return 0.5 * jnp.tanh(0.5 * x) + 0.5

    def kernel(gx_ref, h0_ref, c0_ref, whh_ref, out_ref, hn_ref, cn_ref,
               h_sc, c_sc):
        chunk = pl.program_id(1)
        n_chunks = pl.num_programs(1)
        last = n_chunks - 1

        @pl.when(chunk == 0)
        def _init():
            # Fresh recurrence state for every batch block.
            h_sc[...] = h0_ref[0].astype(jnp.float32)
            c_sc[...] = c0_ref[0].astype(jnp.float32)

        whh = whh_ref[...]                                     # (Hp, 4*Hp)

        def run_steps(n_steps):
            def step(s, carry):
                h, c = carry
                # Input projection (x@W_ih^T + b) was hoisted out of the
                # recurrence; only the unavoidable h@W_hh^T happens per step.
                gates = (gx_ref[s].astype(jnp.float32)
                         + jnp.dot(h.astype(whh.dtype), whh,
                                   preferred_element_type=jnp.float32))
                # Gate slices are lane-aligned (Hp is a multiple of 128).
                i = _sigmoid(gates[:, 0 * Hp:1 * Hp])
                f = _sigmoid(gates[:, 1 * Hp:2 * Hp])
                g = jnp.tanh(gates[:, 2 * Hp:3 * Hp])
                o = _sigmoid(gates[:, 3 * Hp:4 * Hp])
                c_new = f * c + i * g
                h_new = o * jnp.tanh(c_new)
                out_ref[s] = h_new.astype(out_ref.dtype)
                return h_new, c_new

            h_fin, c_fin = lax.fori_loop(0, n_steps, step,
                                         (h_sc[...], c_sc[...]),
                                         unroll=unroll)
            h_sc[...] = h_fin
            c_sc[...] = c_fin

        if last_chunk_steps == TT:
            run_steps(TT)                      # uniform chunks (T % TT == 0)
        else:
            # Ragged tail: the final chunk runs a statically shorter loop.
            @pl.when(chunk != last)
            def _full():
                run_steps(TT)

            @pl.when(chunk == last)
            def _tail():
                run_steps(last_chunk_steps)

        @pl.when(chunk == last)
        def _final():
            hn_ref[0] = h_sc[...].astype(hn_ref.dtype)
            cn_ref[0] = c_sc[...].astype(cn_ref.dtype)

    return kernel


def encoder_lstm_forward(inputs, hidden, params, *, tt=8, batch_blocks=None,
                         compute_dtype=jnp.bfloat16,
                         gates_dtype=jnp.float32):
    """Pallas equivalent of EncoderLSTM.forward(inputs, hidden).

    compute_dtype : dtype of the matmul weights (W_ih in the hoisted GEMM and
                    the VMEM-resident W_hh^T) and of h as fed to the MXU.
                    Gate math and h/c state stay float32.
    gates_dtype   : dtype of the streamed pre-activations gates_x = x@W_ih^T+b
                    (dominant HBM traffic). f32 by default for accuracy;
                    bf16 halves HBM traffic if tolerable.
    """
    h0, c0 = hidden
    w_ih, w_hh, b_ih, b_hh = params       # PyTorch: (4H,E),(4H,H),(4H,),(4H,)
    T, B, E = inputs.shape
    H = h0.shape[-1]
    out_dtype = inputs.dtype

    Hp = _round_up(H, LANE)               # lane-aligned gate blocks
    Bp0 = _round_up(B, SUBLANE)           # sublane / MXU-row padding

    # Batch blocks -> leading "parallel" grid axis (both TensorCores on v7x),
    # and halves the per-block gates_x / out VMEM footprint.
    if batch_blocks is None:
        n_bblk = 2 if Bp0 >= 2 * SUBLANE else 1
    else:
        n_bblk = max(1, int(batch_blocks))
    BB = _round_up(_cdiv(Bp0, n_bblk), SUBLANE)
    Bp = BB * n_bblk

    # Per-generation VMEM capacity / budget.
    try:
        vmem_cap = int(pltpu.get_tpu_info().vmem_capacity_bytes)
    except Exception:
        vmem_cap = 64 << 20               # conservative (v7x-sized) fallback
    budget = int(0.7 * vmem_cap)

    itemsize = lambda dt: jnp.dtype(dt).itemsize

    def footprint(tt_):
        whh_b = 2 * Hp * 4 * Hp * itemsize(compute_dtype)   # double-buffered
        gx_b = 2 * tt_ * BB * 4 * Hp * itemsize(gates_dtype)
        out_b = 2 * tt_ * BB * Hp * itemsize(out_dtype)
        h0c0_b = 2 * 2 * BB * Hp * itemsize(h0.dtype)
        hncn_b = 2 * 2 * BB * Hp * itemsize(out_dtype)
        state_b = 2 * BB * Hp * 4
        return whh_b + gx_b + out_b + h0c0_b + hncn_b + state_b

    TT = max(1, min(int(tt), T))
    while TT > 1 and footprint(TT) > budget:
        TT -= 1
    n_chunks = _cdiv(T, TT)
    Tp = n_chunks * TT
    last_chunk_steps = T - (n_chunks - 1) * TT        # in [1, TT]

    vmem_limit = int(min(int(0.9 * vmem_cap),
                         max(footprint(TT) + (4 << 20), 32 << 20)))

    # Unroll the step loop only while the per-step gates tile is small.
    unroll = (BB * 4 * Hp * 4) <= (128 << 10)

    # --- Pad weights: gate k occupies rows [k*Hp, k*Hp+H); padded gate rows /
    # --- columns have zero weight AND zero bias, so padded h/c stay exactly 0.
    def pad_gate_rows(w, cols_to=None):
        K = w.shape[1]
        out = jnp.zeros((4 * Hp, K), w.dtype)
        for k in range(4):
            out = out.at[k * Hp:k * Hp + H].set(w[k * H:(k + 1) * H])
        if cols_to is not None and cols_to != K:
            out = jnp.pad(out, ((0, 0), (0, cols_to - K)))
        return out

    w_ih_p = pad_gate_rows(w_ih)                      # (4Hp, E)
    w_hh_p = pad_gate_rows(w_hh, cols_to=Hp)          # (4Hp, Hp)
    b_sum = (b_ih + b_hh).astype(jnp.float32)
    b_p = jnp.zeros((4 * Hp,), jnp.float32)
    for k in range(4):
        b_p = b_p.at[k * Hp:k * Hp + H].set(b_sum[k * H:(k + 1) * H])

    # Pad batch / hidden of the state and inputs (zero-padded -> invariant).
    inputs_p = jnp.pad(inputs, ((0, 0), (0, Bp - B), (0, 0)))
    h0_p = jnp.pad(h0, ((0, 0), (0, Bp - B), (0, Hp - H)))
    c0_p = jnp.pad(c0, ((0, 0), (0, Bp - B), (0, Hp - H)))

    # Hoisted input projection: one big GEMM outside the recurrence, bias
    # folded in.  (T, Bp, E) @ (E, 4Hp) -> (T, Bp, 4Hp).
    gates_x = (jnp.einsum("tbe,eg->tbg",
                          inputs_p.astype(compute_dtype),
                          jnp.transpose(w_ih_p).astype(compute_dtype),
                          preferred_element_type=jnp.float32)
               + b_p[None, None, :]).astype(gates_dtype)
    if Tp != T:
        gates_x = jnp.pad(gates_x, ((0, Tp - T), (0, 0), (0, 0)))

    whh_t = jnp.transpose(w_hh_p).astype(compute_dtype)   # (Hp, 4Hp)

    kernel = _make_lstm_kernel(Hp=Hp, TT=TT,
                               last_chunk_steps=last_chunk_steps,
                               unroll=unroll)

    grid_spec = pltpu.PrefetchScalarGridSpec(
        num_scalar_prefetch=0,
        grid=(n_bblk, n_chunks),
        in_specs=[
            pl.BlockSpec((TT, BB, 4 * Hp), lambda b, i: (i, b, 0)),  # gates_x
            pl.BlockSpec((1, BB, Hp), lambda b, i: (0, b, 0)),       # h0
            pl.BlockSpec((1, BB, Hp), lambda b, i: (0, b, 0)),       # c0
            pl.BlockSpec((Hp, 4 * Hp), lambda b, i: (0, 0)),         # W_hh^T
        ],
        out_specs=[
            pl.BlockSpec((TT, BB, Hp), lambda b, i: (i, b, 0)),      # lstm_out
            pl.BlockSpec((1, BB, Hp), lambda b, i: (0, b, 0)),       # h_n
            pl.BlockSpec((1, BB, Hp), lambda b, i: (0, b, 0)),       # c_n
        ],
        scratch_shapes=[
            pltpu.VMEM((BB, Hp), jnp.float32),    # h state (per core)
            pltpu.VMEM((BB, Hp), jnp.float32),    # c state (per core)
        ],
    )

    out_shapes = (
        jax.ShapeDtypeStruct((Tp, Bp, Hp), out_dtype),    # lstm_out (padded)
        jax.ShapeDtypeStruct((1, Bp, Hp), out_dtype),     # h_n
        jax.ShapeDtypeStruct((1, Bp, Hp), out_dtype),     # c_n
    )

    out_p, hn_p, cn_p = pl.pallas_call(
        kernel,
        out_shape=out_shapes,
        grid_spec=grid_spec,
        compiler_params=pltpu.CompilerParams(
            dimension_semantics=("parallel", "arbitrary"),  # batch, time
            vmem_limit_bytes=vmem_limit),
    )(gates_x, h0_p, c0_p, whh_t)

    lstm_out = out_p[:T, :B, :H]
    h_n = hn_p[:, :B, :H]
    c_n = cn_p[:, :B, :H]
    return lstm_out, (h_n, c_n)


def lstm_reference(inputs, hidden, params):
    """Pure-JAX reference matching torch.nn.LSTM semantics (single layer)."""
    h0, c0 = hidden
    w_ih, w_hh, b_ih, b_hh = params
    H = h0.shape[-1]

    def step(carry, x_t):
        h, c = carry
        gates = x_t @ w_ih.T + h @ w_hh.T + b_ih + b_hh
        i = jax.nn.sigmoid(gates[:, 0 * H:1 * H])
        f = jax.nn.sigmoid(gates[:, 1 * H:2 * H])
        g = jnp.tanh(gates[:, 2 * H:3 * H])
        o = jax.nn.sigmoid(gates[:, 3 * H:4 * H])
        c_new = f * c + i * g
        h_new = o * jnp.tanh(c_new)
        return (h_new, c_new), h_new

    (h_n, c_n), outs = jax.lax.scan(step, (h0[0], c0[0]), inputs)
    return outs, (h_n[None], c_n[None])


if __name__ == "__main__":
    # Shapes consistent with EncoderLSTM(embedding_dim, hidden_dim).
    T, B, E, H = 8, 2, 16, 32

    key = jax.random.PRNGKey(0)
    k_x, k_wih, k_whh, k_bih, k_bhh, k_x2, k_h2, k_c2 = jax.random.split(key, 8)

    scale = 1.0 / np.sqrt(H)   # PyTorch default uniform(-1/sqrt(H), 1/sqrt(H))
    w_ih = jax.random.uniform(k_wih, (4 * H, E), jnp.float32, -scale, scale)
    w_hh = jax.random.uniform(k_whh, (4 * H, H), jnp.float32, -scale, scale)
    b_ih = jax.random.uniform(k_bih, (4 * H,), jnp.float32, -scale, scale)
    b_hh = jax.random.uniform(k_bhh, (4 * H,), jnp.float32, -scale, scale)
    params = (w_ih, w_hh, b_ih, b_hh)

    inputs = jax.random.normal(k_x, (T, B, E), jnp.float32)
    hidden = (jnp.zeros((1, B, H), jnp.float32),
              jnp.zeros((1, B, H), jnp.float32))
    ref_out, (ref_h, ref_c) = lstm_reference(inputs, hidden, params)

    # 1) Strict f32 check, multi-chunk time grid.
    lstm_out, (h_n, c_n) = encoder_lstm_forward(
        inputs, hidden, params, tt=4,
        compute_dtype=jnp.float32, gates_dtype=jnp.float32)
    jax.block_until_ready(lstm_out)
    assert np.allclose(np.asarray(lstm_out), np.asarray(ref_out), atol=1e-4, rtol=1e-4)
    assert np.allclose(np.asarray(h_n), np.asarray(ref_h), atol=1e-4, rtol=1e-4)
    assert np.allclose(np.asarray(c_n), np.asarray(ref_c), atol=1e-4, rtol=1e-4)

    # 2) Ragged T + two batch blocks (parallel axis) + nonzero initial state.
    T2, B2 = 7, 10
    inputs2 = jax.random.normal(k_x2, (T2, B2, E), jnp.float32)
    hidden2 = (0.1 * jax.random.normal(k_h2, (1, B2, H), jnp.float32),
               0.1 * jax.random.normal(k_c2, (1, B2, H), jnp.float32))
    ref_out2, (ref_h2, ref_c2) = lstm_reference(inputs2, hidden2, params)
    out2, (h2, c2) = encoder_lstm_forward(
        inputs2, hidden2, params, tt=4, batch_blocks=2,
        compute_dtype=jnp.float32, gates_dtype=jnp.float32)
    jax.block_until_ready(out2)
    assert np.allclose(np.asarray(out2), np.asarray(ref_out2), atol=1e-4, rtol=1e-4)
    assert np.allclose(np.asarray(h2), np.asarray(ref_h2), atol=1e-4, rtol=1e-4)
    assert np.allclose(np.asarray(c2), np.asarray(ref_c2), atol=1e-4, rtol=1e-4)

    # 3) Default path: bf16 weights, f32 gates_x stream — loose smoke check.
    out_bf, (h_bf, c_bf) = encoder_lstm_forward(inputs, hidden, params)
    jax.block_until_ready(out_bf)
    assert np.allclose(np.asarray(out_bf), np.asarray(ref_out), atol=5e-2, rtol=5e-2)
    assert np.allclose(np.asarray(h_bf), np.asarray(ref_h), atol=5e-2, rtol=5e-2)

    print("KERNEL_OK")
</pallas_src>

<mosaic_0001>
module attributes {stable_mosaic.version = 11 : i64} {
  func.func @kernel(%arg0: i32, %arg1: i32, %arg2: memref<4x8x512xf32, #tpu.memory_space<vmem>>, %arg3: memref<1x8x128xf32, #tpu.memory_space<vmem>>, %arg4: memref<1x8x128xf32, #tpu.memory_space<vmem>>, %arg5: memref<128x512xf32, #tpu.memory_space<vmem>>, %arg6: memref<4x8x128xf32, #tpu.memory_space<vmem>>, %arg7: memref<1x8x128xf32, #tpu.memory_space<vmem>>, %arg8: memref<1x8x128xf32, #tpu.memory_space<vmem>>, %arg9: memref<8x128xf32, #tpu.memory_space<vmem>>, %arg10: memref<8x128xf32, #tpu.memory_space<vmem>>) attributes {dimension_semantics = [#tpu.dimension_semantics<parallel>, #tpu.dimension_semantics<arbitrary>], iteration_bounds = array<i64: 1, 2>, scalar_prefetch = 0 : i64, scratch_operands = 2 : i64, tpu.core_type = #tpu.core_type<tc>, window_params = [{transform_indices = @transform_0, window_bounds = array<i64: 4, 8, 512>}, {transform_indices = @transform_1, window_bounds = array<i64: 1, 8, 128>}, {transform_indices = @transform_2, window_bounds = array<i64: 1, 8, 128>}, {pipeline_mode = #tpu.pipeline_mode<synchronous>, transform_indices = @transform_3, window_bounds = array<i64: 128, 512>}, {transform_indices = @transform_4, window_bounds = array<i64: 4, 8, 128>}, {transform_indices = @transform_5, window_bounds = array<i64: 1, 8, 128>}, {transform_indices = @transform_6, window_bounds = array<i64: 1, 8, 128>}]} {
    %c0_i32 = arith.constant 0 : i32
    %0 = arith.cmpi eq, %arg1, %c0_i32 : i32
    %1 = arith.extui %0 : i1 to i32
    %c0_i32_0 = arith.constant 0 : i32
    %2 = arith.cmpi ne, %1, %c0_i32_0 : i32
    scf.if %2 {
      %c0_68 = arith.constant 0 : index
      %c0_69 = arith.constant 0 : index
      %c0_70 = arith.constant 0 : index
      %171 = vector.load %arg3[%c0_68, %c0_69, %c0_70] : memref<1x8x128xf32, #tpu.memory_space<vmem>>, vector<1x8x128xf32>
      %172 = vector.shape_cast %171 : vector<1x8x128xf32> to vector<8x128xf32>
      %c0_71 = arith.constant 0 : index
      %c0_72 = arith.constant 0 : index
      %173 = vector.load %arg9[%c0_71, %c0_72] : memref<8x128xf32, #tpu.memory_space<vmem>>, vector<8x128xf32>
      tpu.vector_store %arg9[%c0_71, %c0_72], %172 {strides = array<i32>} : memref<8x128xf32, #tpu.memory_space<vmem>>, vector<8x128xf32>,
      %c0_73 = arith.constant 0 : index
      %c0_74 = arith.constant 0 : index
      %c0_75 = arith.constant 0 : index
      %174 = vector.load %arg4[%c0_73, %c0_74, %c0_75] : memref<1x8x128xf32, #tpu.memory_space<vmem>>, vector<1x8x128xf32>
      %175 = vector.shape_cast %174 : vector<1x8x128xf32> to vector<8x128xf32>
      %c0_76 = arith.constant 0 : index
      %c0_77 = arith.constant 0 : index
      %176 = vector.load %arg10[%c0_76, %c0_77] : memref<8x128xf32, #tpu.memory_space<vmem>>, vector<8x128xf32>
      tpu.vector_store %arg10[%c0_76, %c0_77], %175 {strides = array<i32>} : memref<8x128xf32, #tpu.memory_space<vmem>>, vector<8x128xf32>,
    } else {
    }
    %c0 = arith.constant 0 : index
    %c0_1 = arith.constant 0 : index
    %3 = vector.load %arg5[%c0, %c0_1] : memref<128x512xf32, #tpu.memory_space<vmem>>, vector<128x512xf32>
    %c0_2 = arith.constant 0 : index
    %c0_3 = arith.constant 0 : index
    %4 = vector.load %arg9[%c0_2, %c0_3] : memref<8x128xf32, #tpu.memory_space<vmem>>, vector<8x128xf32>
    %c0_4 = arith.constant 0 : index
    %c0_5 = arith.constant 0 : index
    %5 = vector.load %arg10[%c0_4, %c0_5] : memref<8x128xf32, #tpu.memory_space<vmem>>, vector<8x128xf32>
    %c0_i32_6 = arith.constant 0 : i32
    %6 = arith.index_cast %c0_i32_6 : i32 to index
    %c0_7 = arith.constant 0 : index
    %c0_8 = arith.constant 0 : index
    %7 = vector.load %arg2[%6, %c0_7, %c0_8] : memref<4x8x512xf32, #tpu.memory_space<vmem>>, vector<1x8x512xf32>
    %8 = vector.shape_cast %7 : vector<1x8x512xf32> to vector<8x512xf32>
    %cst = arith.constant dense<0.000000e+00> : vector<8x512xf32>
    %9 = tpu.matmul %4, %3, %cst {dimension_numbers = #tpu.dot_dimension_numbers<[1], [0], [0], [1], [0, 0, 1, 1], [], []>} : vector<8x128xf32>, vector<128x512xf32>, vector<8x512xf32> -> vector<8x512xf32>
    %10 = arith.addf %8, %9 : vector<8x512xf32>
    %11 = vector.extract_strided_slice %10 {offsets = [0, 0], sizes = [8, 128], strides = [1, 1]} : vector<8x512xf32> to vector<8x128xf32>
    %cst_9 = arith.constant 5.000000e-01 : f32
    %12 = vector.broadcast %cst_9 : f32 to vector<8x128xf32>
    %13 = arith.mulf %12, %11 : vector<8x128xf32>
    %14 = math.tanh %13 : vector<8x128xf32>
    %cst_10 = arith.constant 5.000000e-01 : f32
    %15 = vector.broadcast %cst_10 : f32 to vector<8x128xf32>
    %16 = arith.mulf %15, %14 : vector<8x128xf32>
    %cst_11 = arith.constant 5.000000e-01 : f32
    %17 = vector.broadcast %cst_11 : f32 to vector<8x128xf32>
    %18 = arith.addf %16, %17 : vector<8x128xf32>
    %19 = vector.extract_strided_slice %10 {offsets = [0, 128], sizes = [8, 128], strides = [1, 1]} : vector<8x512xf32> to vector<8x128xf32>
    %cst_12 = arith.constant 5.000000e-01 : f32
    %20 = vector.broadcast %cst_12 : f32 to vector<8x128xf32>
    %21 = arith.mulf %20, %19 : vector<8x128xf32>
    %22 = math.tanh %21 : vector<8x128xf32>
    %cst_13 = arith.constant 5.000000e-01 : f32
    %23 = vector.broadcast %cst_13 : f32 to vector<8x128xf32>
    %24 = arith.mulf %23, %22 : vector<8x128xf32>
    %cst_14 = arith.constant 5.000000e-01 : f32
    %25 = vector.broadcast %cst_14 : f32 to vector<8x128xf32>
    %26 = arith.addf %24, %25 : vector<8x128xf32>
    %27 = vector.extract_strided_slice %10 {offsets = [0, 256], sizes = [8, 128], strides = [1, 1]} : vector<8x512xf32> to vector<8x128xf32>
    %28 = math.tanh %27 : vector<8x128xf32>
    %29 = vector.extract_strided_slice %10 {offsets = [0, 384], sizes = [8, 128], strides = [1, 1]} : vector<8x512xf32> to vector<8x128xf32>
    %cst_15 = arith.constant 5.000000e-01 : f32
    %30 = vector.broadcast %cst_15 : f32 to vector<8x128xf32>
    %31 = arith.mulf %30, %29 : vector<8x128xf32>
    %32 = math.tanh %31 : vector<8x128xf32>
    %cst_16 = arith.constant 5.000000e-01 : f32
    %33 = vector.broadcast %cst_16 : f32 to vector<8x128xf32>
    %34 = arith.mulf %33, %32 : vector<8x128xf32>
    %cst_17 = arith.constant 5.000000e-01 : f32
    %35 = vector.broadcast %cst_17 : f32 to vector<8x128xf32>
    %36 = arith.addf %34, %35 : vector<8x128xf32>
    %37 = arith.mulf %26, %5 : vector<8x128xf32>
    %38 = arith.mulf %18, %28 : vector<8x128xf32>
    %39 = arith.addf %37, %38 : vector<8x128xf32>
    %40 = math.tanh %39 : vector<8x128xf32>
    %41 = arith.mulf %36, %40 : vector<8x128xf32>
    %42 = arith.index_cast %c0_i32_6 : i32 to index
    %c0_18 = arith.constant 0 : index
    %c0_19 = arith.constant 0 : index
    %43 = vector.load %arg6[%42, %c0_18, %c0_19] : memref<4x8x128xf32, #tpu.memory_space<vmem>>, vector<1x8x128xf32>
    %44 = vector.shape_cast %43 : vector<1x8x128xf32> to vector<8x128xf32>
    %45 = vector.shape_cast %41 : vector<8x128xf32> to vector<1x8x128xf32>
    tpu.vector_store %arg6[%42, %c0_18, %c0_19], %45 {strides = array<i32>} : memref<4x8x128xf32, #tpu.memory_space<vmem>>, vector<1x8x128xf32>,
    %c1_i32 = arith.constant 1 : i32
    %46 = arith.index_cast %c1_i32 : i32 to index
    %c0_20 = arith.constant 0 : index
    %c0_21 = arith.constant 0 : index
    %47 = vector.load %arg2[%46, %c0_20, %c0_21] : memref<4x8x512xf32, #tpu.memory_space<vmem>>, vector<1x8x512xf32>
    %48 = vector.shape_cast %47 : vector<1x8x512xf32> to vector<8x512xf32>
    %cst_22 = arith.constant dense<0.000000e+00> : vector<8x512xf32>
    %49 = tpu.matmul %41, %3, %cst_22 {dimension_numbers = #tpu.dot_dimension_numbers<[1], [0], [0], [1], [0, 0, 1, 1], [], []>} : vector<8x128xf32>, vector<128x512xf32>, vector<8x512xf32> -> vector<8x512xf32>
    %50 = arith.addf %48, %49 : vector<8x512xf32>
    %51 = vector.extract_strided_slice %50 {offsets = [0, 0], sizes = [8, 128], strides = [1, 1]} : vector<8x512xf32> to vector<8x128xf32>
    %cst_23 = arith.constant 5.000000e-01 : f32
    %52 = vector.broadcast %cst_23 : f32 to vector<8x128xf32>
    %53 = arith.mulf %52, %51 : vector<8x128xf32>
    %54 = math.tanh %53 : vector<8x128xf32>
    %cst_24 = arith.constant 5.000000e-01 : f32
    %55 = vector.broadcast %cst_24 : f32 to vector<8x128xf32>
    %56 = arith.mulf %55, %54 : vector<8x128xf32>
    %cst_25 = arith.constant 5.000000e-01 : f32
    %57 = vector.broadcast %cst_25 : f32 to vector<8x128xf32>
    %58 = arith.addf %56, %57 : vector<8x128xf32>
    %59 = vector.extract_strided_slice %50 {offsets = [0, 128], sizes = [8, 128], strides = [1, 1]} : vector<8x512xf32> to vector<8x128xf32>
    %cst_26 = arith.constant 5.000000e-01 : f32
    %60 = vector.broadcast %cst_26 : f32 to vector<8x128xf32>
    %61 = arith.mulf %60, %59 : vector<8x128xf32>
    %62 = math.tanh %61 : vector<8x128xf32>
    %cst_27 = arith.constant 5.000000e-01 : f32
    %63 = vector.broadcast %cst_27 : f32 to vector<8x128xf32>
    %64 = arith.mulf %63, %62 : vector<8x128xf32>
    %cst_28 = arith.constant 5.000000e-01 : f32
    %65 = vector.broadcast %cst_28 : f32 to vector<8x128xf32>
    %66 = arith.addf %64, %65 : vector<8x128xf32>
    %67 = vector.extract_strided_slice %50 {offsets = [0, 256], sizes = [8, 128], strides = [1, 1]} : vector<8x512xf32> to vector<8x128xf32>
    %68 = math.tanh %67 : vector<8x128xf32>
    %69 = vector.extract_strided_slice %50 {offsets = [0, 384], sizes = [8, 128], strides = [1, 1]} : vector<8x512xf32> to vector<8x128xf32>
    %cst_29 = arith.constant 5.000000e-01 : f32
    %70 = vector.broadcast %cst_29 : f32 to vector<8x128xf32>
    %71 = arith.mulf %70, %69 : vector<8x128xf32>
    %72 = math.tanh %71 : vector<8x128xf32>
    %cst_30 = arith.constant 5.000000e-01 : f32
    %73 = vector.broadcast %cst_30 : f32 to vector<8x128xf32>
    %74 = arith.mulf %73, %72 : vector<8x128xf32>
    %cst_31 = arith.constant 5.000000e-01 : f32
    %75 = vector.broadcast %cst_31 : f32 to vector<8x128xf32>
    %76 = arith.addf %74, %75 : vector<8x128xf32>
    %77 = arith.mulf %66, %39 : vector<8x128xf32>
    %78 = arith.mulf %58, %68 : vector<8x128xf32>
    %79 = arith.addf %77, %78 : vector<8x128xf32>
    %80 = math.tanh %79 : vector<8x128xf32>
    %81 = arith.mulf %76, %80 : vector<8x128xf32>
    %82 = arith.index_cast %c1_i32 : i32 to index
    %c0_32 = arith.constant 0 : index
    %c0_33 = arith.constant 0 : index
    %83 = vector.load %arg6[%82, %c0_32, %c0_33] : memref<4x8x128xf32, #tpu.memory_space<vmem>>, vector<1x8x128xf32>
    %84 = vector.shape_cast %83 : vector<1x8x128xf32> to vector<8x128xf32>
    %85 = vector.shape_cast %81 : vector<8x128xf32> to vector<1x8x128xf32>
    tpu.vector_store %arg6[%82, %c0_32, %c0_33], %85 {strides = array<i32>} : memref<4x8x128xf32, #tpu.memory_space<vmem>>, vector<1x8x128xf32>,
    %c2_i32 = arith.constant 2 : i32
    %86 = arith.index_cast %c2_i32 : i32 to index
    %c0_34 = arith.constant 0 : index
    %c0_35 = arith.constant 0 : index
    %87 = vector.load %arg2[%86, %c0_34, %c0_35] : memref<4x8x512xf32, #tpu.memory_space<vmem>>, vector<1x8x512xf32>
    %88 = vector.shape_cast %87 : vector<1x8x512xf32> to vector<8x512xf32>
    %cst_36 = arith.constant dense<0.000000e+00> : vector<8x512xf32>
    %89 = tpu.matmul %81, %3, %cst_36 {dimension_numbers = #tpu.dot_dimension_numbers<[1], [0], [0], [1], [0, 0, 1, 1], [], []>} : vector<8x128xf32>, vector<128x512xf32>, vector<8x512xf32> -> vector<8x512xf32>
    %90 = arith.addf %88, %89 : vector<8x512xf32>
    %91 = vector.extract_strided_slice %90 {offsets = [0, 0], sizes = [8, 128], strides = [1, 1]} : vector<8x512xf32> to vector<8x128xf32>
    %cst_37 = arith.constant 5.000000e-01 : f32
    %92 = vector.broadcast %cst_37 : f32 to vector<8x128xf32>
    %93 = arith.mulf %92, %91 : vector<8x128xf32>
    %94 = math.tanh %93 : vector<8x128xf32>
    %cst_38 = arith.constant 5.000000e-01 : f32
    %95 = vector.broadcast %cst_38 : f32 to vector<8x128xf32>
    %96 = arith.mulf %95, %94 : vector<8x128xf32>
    %cst_39 = arith.constant 5.000000e-01 : f32
    %97 = vector.broadcast %cst_39 : f32 to vector<8x128xf32>
    %98 = arith.addf %96, %97 : vector<8x128xf32>
    %99 = vector.extract_strided_slice %90 {offsets = [0, 128], sizes = [8, 128], strides = [1, 1]} : vector<8x512xf32> to vector<8x128xf32>
    %cst_40 = arith.constant 5.000000e-01 : f32
    %100 = vector.broadcast %cst_40 : f32 to vector<8x128xf32>
    %101 = arith.mulf %100, %99 : vector<8x128xf32>
    %102 = math.tanh %101 : vector<8x128xf32>
    %cst_41 = arith.constant 5.000000e-01 : f32
    %103 = vector.broadcast %cst_41 : f32 to vector<8x128xf32>
    %104 = arith.mulf %103, %102 : vector<8x128xf32>
    %cst_42 = arith.constant 5.000000e-01 : f32
    %105 = vector.broadcast %cst_42 : f32 to vector<8x128xf32>
    %106 = arith.addf %104, %105 : vector<8x128xf32>
    %107 = vector.extract_strided_slice %90 {offsets = [0, 256], sizes = [8, 128], strides = [1, 1]} : vector<8x512xf32> to vector<8x128xf32>
    %108 = math.tanh %107 : vector<8x128xf32>
    %109 = vector.extract_strided_slice %90 {offsets = [0, 384], sizes = [8, 128], strides = [1, 1]} : vector<8x512xf32> to vector<8x128xf32>
    %cst_43 = arith.constant 5.000000e-01 : f32
    %110 = vector.broadcast %cst_43 : f32 to vector<8x128xf32>
    %111 = arith.mulf %110, %109 : vector<8x128xf32>
    %112 = math.tanh %111 : vector<8x128xf32>
    %cst_44 = arith.constant 5.000000e-01 : f32
    %113 = vector.broadcast %cst_44 : f32 to vector<8x128xf32>
    %114 = arith.mulf %113, %112 : vector<8x128xf32>
    %cst_45 = arith.constant 5.000000e-01 : f32
    %115 = vector.broadcast %cst_45 : f32 to vector<8x128xf32>
    %116 = arith.addf %114, %115 : vector<8x128xf32>
    %117 = arith.mulf %106, %79 : vector<8x128xf32>
    %118 = arith.mulf %98, %108 : vector<8x128xf32>
    %119 = arith.addf %117, %118 : vector<8x128xf32>
    %120 = math.tanh %119 : vector<8x128xf32>
    %121 = arith.mulf %116, %120 : vector<8x128xf32>
    %122 = arith.index_cast %c2_i32 : i32 to index
    %c0_46 = arith.constant 0 : index
    %c0_47 = arith.constant 0 : index
    %123 = vector.load %arg6[%122, %c0_46, %c0_47] : memref<4x8x128xf32, #tpu.memory_space<vmem>>, vector<1x8x128xf32>
    %124 = vector.shape_cast %123 : vector<1x8x128xf32> to vector<8x128xf32>
    %125 = vector.shape_cast %121 : vector<8x128xf32> to vector<1x8x128xf32>
    tpu.vector_store %arg6[%122, %c0_46, %c0_47], %125 {strides = array<i32>} : memref<4x8x128xf32, #tpu.memory_space<vmem>>, vector<1x8x128xf32>,
    %c3_i32 = arith.constant 3 : i32
    %126 = arith.index_cast %c3_i32 : i32 to index
    %c0_48 = arith.constant 0 : index
    %c0_49 = arith.constant 0 : index
    %127 = vector.load %arg2[%126, %c0_48, %c0_49] : memref<4x8x512xf32, #tpu.memory_space<vmem>>, vector<1x8x512xf32>
    %128 = vector.shape_cast %127 : vector<1x8x512xf32> to vector<8x512xf32>
    %cst_50 = arith.constant dense<0.000000e+00> : vector<8x512xf32>
    %129 = tpu.matmul %121, %3, %cst_50 {dimension_numbers = #tpu.dot_dimension_numbers<[1], [0], [0], [1], [0, 0, 1, 1], [], []>} : vector<8x128xf32>, vector<128x512xf32>, vector<8x512xf32> -> vector<8x512xf32>
    %130 = arith.addf %128, %129 : vector<8x512xf32>
    %131 = vector.extract_strided_slice %130 {offsets = [0, 0], sizes = [8, 128], strides = [1, 1]} : vector<8x512xf32> to vector<8x128xf32>
    %cst_51 = arith.constant 5.000000e-01 : f32
    %132 = vector.broadcast %cst_51 : f32 to vector<8x128xf32>
    %133 = arith.mulf %132, %131 : vector<8x128xf32>
    %134 = math.tanh %133 : vector<8x128xf32>
    %cst_52 = arith.constant 5.000000e-01 : f32
    %135 = vector.broadcast %cst_52 : f32 to vector<8x128xf32>
    %136 = arith.mulf %135, %134 : vector<8x128xf32>
    %cst_53 = arith.constant 5.000000e-01 : f32
    %137 = vector.broadcast %cst_53 : f32 to vector<8x128xf32>
    %138 = arith.addf %136, %137 : vector<8x128xf32>
    %139 = vector.extract_strided_slice %130 {offsets = [0, 128], sizes = [8, 128], strides = [1, 1]} : vector<8x512xf32> to vector<8x128xf32>
    %cst_54 = arith.constant 5.000000e-01 : f32
    %140 = vector.broadcast %cst_54 : f32 to vector<8x128xf32>
    %141 = arith.mulf %140, %139 : vector<8x128xf32>
    %142 = math.tanh %141 : vector<8x128xf32>
    %cst_55 = arith.constant 5.000000e-01 : f32
    %143 = vector.broadcast %cst_55 : f32 to vector<8x128xf32>
    %144 = arith.mulf %143, %142 : vector<8x128xf32>
    %cst_56 = arith.constant 5.000000e-01 : f32
    %145 = vector.broadcast %cst_56 : f32 to vector<8x128xf32>
    %146 = arith.addf %144, %145 : vector<8x128xf32>
    %147 = vector.extract_strided_slice %130 {offsets = [0, 256], sizes = [8, 128], strides = [1, 1]} : vector<8x512xf32> to vector<8x128xf32>
    %148 = math.tanh %147 : vector<8x128xf32>
    %149 = vector.extract_strided_slice %130 {offsets = [0, 384], sizes = [8, 128], strides = [1, 1]} : vector<8x512xf32> to vector<8x128xf32>
    %cst_57 = arith.constant 5.000000e-01 : f32
    %150 = vector.broadcast %cst_57 : f32 to vector<8x128xf32>
    %151 = arith.mulf %150, %149 : vector<8x128xf32>
    %152 = math.tanh %151 : vector<8x128xf32>
    %cst_58 = arith.constant 5.000000e-01 : f32
    %153 = vector.broadcast %cst_58 : f32 to vector<8x128xf32>
    %154 = arith.mulf %153, %152 : vector<8x128xf32>
    %cst_59 = arith.constant 5.000000e-01 : f32
    %155 = vector.broadcast %cst_59 : f32 to vector<8x128xf32>
    %156 = arith.addf %154, %155 : vector<8x128xf32>
    %157 = arith.mulf %146, %119 : vector<8x128xf32>
    %158 = arith.mulf %138, %148 : vector<8x128xf32>
    %159 = arith.addf %157, %158 : vector<8x128xf32>
    %160 = math.tanh %159 : vector<8x128xf32>
    %161 = arith.mulf %156, %160 : vector<8x128xf32>
    %162 = arith.index_cast %c3_i32 : i32 to index
    %c0_60 = arith.constant 0 : index
    %c0_61 = arith.constant 0 : index
    %163 = vector.load %arg6[%162, %c0_60, %c0_61] : memref<4x8x128xf32, #tpu.memory_space<vmem>>, vector<1x8x128xf32>
    %164 = vector.shape_cast %163 : vector<1x8x128xf32> to vector<8x128xf32>
    %165 = vector.shape_cast %161 : vector<8x128xf32> to vector<1x8x128xf32>
    tpu.vector_store %arg6[%162, %c0_60, %c0_61], %165 {strides = array<i32>} : memref<4x8x128xf32, #tpu.memory_space<vmem>>, vector<1x8x128xf32>,
    %c4_i32 = arith.constant 4 : i32
    %c0_62 = arith.constant 0 : index
    %c0_63 = arith.constant 0 : index
    %166 = vector.load %arg9[%c0_62, %c0_63] : memref<8x128xf32, #tpu.memory_space<vmem>>, vector<8x128xf32>
    tpu.vector_store %arg9[%c0_62, %c0_63], %161 {strides = array<i32>} : memref<8x128xf32, #tpu.memory_space<vmem>>, vector<8x128xf32>,
    %c0_64 = arith.constant 0 : index
    %c0_65 = arith.constant 0 : index
    %167 = vector.load %arg10[%c0_64, %c0_65] : memref<8x128xf32, #tpu.memory_space<vmem>>, vector<8x128xf32>
    tpu.vector_store %arg10[%c0_64, %c0_65], %159 {strides = array<i32>} : memref<8x128xf32, #tpu.memory_space<vmem>>, vector<8x128xf32>,
    %c1_i32_66 = arith.constant 1 : i32
    %168 = arith.cmpi eq, %arg1, %c1_i32_66 : i32
    %169 = arith.extui %168 : i1 to i32
    %c0_i32_67 = arith.constant 0 : i32
    %170 = arith.cmpi ne, %169, %c0_i32_67 : i32
    scf.if %170 {
      %c0_68 = arith.constant 0 : index
      %c0_69 = arith.constant 0 : index
      %171 = vector.load %arg9[%c0_68, %c0_69] : memref<8x128xf32, #tpu.memory_space<vmem>>, vector<8x128xf32>
      %c0_70 = arith.constant 0 : index
      %c0_71 = arith.constant 0 : index
      %c0_72 = arith.constant 0 : index
      %172 = vector.load %arg7[%c0_70, %c0_71, %c0_72] : memref<1x8x128xf32, #tpu.memory_space<vmem>>, vector<1x8x128xf32>
      %173 = vector.shape_cast %172 : vector<1x8x128xf32> to vector<8x128xf32>
      %174 = vector.shape_cast %171 : vector<8x128xf32> to vector<1x8x128xf32>
      tpu.vector_store %arg7[%c0_70, %c0_71, %c0_72], %174 {strides = array<i32>} : memref<1x8x128xf32, #tpu.memory_space<vmem>>, vector<1x8x128xf32>,
      %c0_73 = arith.constant 0 : index
      %c0_74 = arith.constant 0 : index
      %175 = vector.load %arg10[%c0_73, %c0_74] : memref<8x128xf32, #tpu.memory_space<vmem>>, vector<8x128xf32>
      %c0_75 = arith.constant 0 : index
      %c0_76 = arith.constant 0 : index
      %c0_77 = arith.constant 0 : index
      %176 = vector.load %arg8[%c0_75, %c0_76, %c0_77] : memref<1x8x128xf32, #tpu.memory_space<vmem>>, vector<1x8x128xf32>
      %177 = vector.shape_cast %176 : vector<1x8x128xf32> to vector<8x128xf32>
      %178 = vector.shape_cast %175 : vector<8x128xf32> to vector<1x8x128xf32>
      tpu.vector_store %arg8[%c0_75, %c0_76, %c0_77], %178 {strides = array<i32>} : memref<1x8x128xf32, #tpu.memory_space<vmem>>, vector<1x8x128xf32>,
    } else {
    }
    return
  }
  func.func @transform_0(%arg0: i32, %arg1: i32) -> (i32, i32, i32) {
    %c0_i32 = arith.constant 0 : i32
    %c0_i32_0 = arith.constant 0 : i32
    return %arg1, %arg0, %c0_i32 : i32, i32, i32
  }
  func.func @transform_1(%arg0: i32, %arg1: i32) -> (i32, i32, i32) {
    %c0_i32 = arith.constant 0 : i32
    %c0_i32_0 = arith.constant 0 : i32
    %c0_i32_1 = arith.constant 0 : i32
    return %c0_i32, %arg0, %c0_i32_0 : i32, i32, i32
  }
  func.func @transform_2(%arg0: i32, %arg1: i32) -> (i32, i32, i32) {
    %c0_i32 = arith.constant 0 : i32
    %c0_i32_0 = arith.constant 0 : i32
    %c0_i32_1 = arith.constant 0 : i32
    return %c0_i32, %arg0, %c0_i32_0 : i32, i32, i32
  }
  func.func @transform_3(%arg0: i32, %arg1: i32) -> (i32, i32) {
    %c0_i32 = arith.constant 0 : i32
    %c0_i32_0 = arith.constant 0 : i32
    %c0_i32_1 = arith.constant 0 : i32
    return %c0_i32, %c0_i32_0 : i32, i32
  }
  func.func @transform_4(%arg0: i32, %arg1: i32) -> (i32, i32, i32) {
    %c0_i32 = arith.constant 0 : i32
    %c0_i32_0 = arith.constant 0 : i32
    return %arg1, %arg0, %c0_i32 : i32, i32, i32
  }
  func.func @transform_5(%arg0: i32, %arg1: i32) -> (i32, i32, i32) {
    %c0_i32 = arith.constant 0 : i32
    %c0_i32_0 = arith.constant 0 : i32
    %c0_i32_1 = arith.constant 0 : i32
    return %c0_i32, %arg0, %c0_i32_0 : i32, i32, i32
  }
  func.func @transform_6(%arg0: i32, %arg1: i32) -> (i32, i32, i32) {
    %c0_i32 = arith.constant 0 : i32
    %c0_i32_0 = arith.constant 0 : i32
    %c0_i32_1 = arith.constant 0 : i32
    return %c0_i32, %arg0, %c0_i32_0 : i32, i32, i32
  }
}

</mosaic_0001>

<bundles_post_ra>
// kernel: tpu_custom_call.1
= control target key start
LH: loop header
LB: loop body
LE: loop exit
PB: predicated region body
PF: predicated region fallthrough
CT: control target
= control target key end

     0   :  { %s2188_s0 = inlined_call_operand.hbm [shape: f32[8,8,512], index: 0, kind: input, shape index: {}]   ;;  %s2189_s1 = inlined_call_operand.hbm [shape: f32[1,8,128], index: 1, kind: input, shape index: {}]   ;;  %s2190_s2 = inlined_call_operand.hbm [shape: f32[1,8,128], index: 2, kind: input, shape index: {}]   ;;  %s2191_s3 = inlined_call_operand.hbm [shape: f32[128,512], index: 3, kind: input, shape index: {}]   ;;  %s2192_s4 = inlined_call_operand.hbm [shape: f32[8,8,128], index: 4, kind: output, shape index: {0}]   ;;  %s2193_s5 = inlined_call_operand.hbm [shape: f32[1,8,128], index: 5, kind: output, shape index: {1}]   ;;  %s2194_s6 = inlined_call_operand.hbm [shape: f32[1,8,128], index: 6, kind: output, shape index: {2}]  }
   0x1   :  { %2220 = sst [smem:[#allocation42_spill]] %s2189_s1 }
   0x2   :  { %2221 = sst [smem:[#allocation43_spill]] %s2190_s2 }
   0x3   :  { %2222 = sst [smem:[#allocation44_spill]] %s2191_s3 }
   0x4   :  { %12 = vsyncpa [#allocation5], 0 }
   0x5   :  { %14 = vsyncpa [#allocation5 + $0x1], 0 }
   0x6   :  { %15 = vsyncpa [#allocation8], 0 }
   0x7   :  { %16 = vsyncpa [#allocation11], 0 }
   0x8   :  { %17 = vsyncpa [#allocation6], 0 }
   0x9   :  { %19 = vsyncpa [#allocation6 + $0x1], 0 }
   0xa   :  { %20 = vsyncpa [#allocation14], 0  ;;  %s1581_s21 = smov 0   ;;  %s1583_s22 = smov 0  }
   0xb   :  { %s1585_s23 = smov 0   ;;  %s1587_s24 = smov 0  }
   0xc   :  { %s1589_s25 = smov 0   ;;  %s1591_s26 = smov 0  }
   0xd LB: > { %s1068_s27 = sadd.s32 4294967295, %s1535_s26   ;;  %s1069_s28 = sadd.s32 4294967294, %s1535_s26   ;;  %s1535_s26 = sphi %s1591_s26, %s26_s26   ;;  %s1531_s25 = sphi %s1589_s25, %s2283_s25   ;;  %s1527_s24 = sphi %s1587_s24, %s2282_s24   ;;  %s1523_s23 = sphi %s1585_s23, %s2281_s23   ;;  %s1519_s22 = sphi %s1583_s22, %s2280_s22   ;;  %s1515_s21 = sphi %s1581_s21, %s2279_s21  }
   0xe   : > { %p60_p0 = scmp.ne.s32.totalorder %s1519_s22, %s1515_s21  ;;  %p1615_p1 = scmp.eq.s32.totalorder %s1068_s27, 0 }
   0xf   : > { %p1619_p2 = scmp.eq.s32.totalorder %s1068_s27, 1  ;;  %p165_p3 = scmp.eq.s32.totalorder %s1069_s28, 1 }
  0x10   : > { %p1625_p4 = por %p1615_p1, %p60_p0  ;;  %p1070_p5 = scmp.ge.s32.totalorder %s1535_s26, 1 }
  0x11   : > { %p1630_p6 = por %p165_p3, %p60_p0  ;;  %p224_p7 = scmp.lt.s32.totalorder %s1535_s26, 3 }
  0x12   : > { %s2228_s1 = sld [smem:[#allocation42_spill]]  ;;  %p1074_p9 = scmp.ge.s32.totalorder %s1535_s26, 2 }
  0x13   : > { %s2226_s8 = scalar_select %p1630_p6, 1, 0 }
  0x14   : > { %p1638_p8 = pnand %p1070_p5, %p224_p7  ;;  %s1537_s13 = smov [#allocation7]  }
  0x15   : > { %2227 = sst [smem:[#allocation21_spill]] %s2226_s8  ;;  %s240_s14 = sshll.u32 %s1537_s13, 4  ;;  %s241_s14 = int_to_ptr.vmem [resolvable:$true] %s240_s14 }
  0x16   : > { %p1138_p10 = pneg %p1638_p8  ;;  %s2230_s2 = sld [smem:[#allocation43_spill]] }
  0x17   : > { %s2232_s3 = sld [smem:[#allocation44_spill]]  ;;  %s1538_s28 = smov [#allocation9]  }
  0x18   : > { %s238_s11 = sshll.u32 %s2228_s1, 4  ;;  %p1650_p11 = pnand %p1138_p10, %p1615_p1  ;;  %s239_s11 = int_to_ptr.hbm [resolvable:$true] %s238_s11 }
  0x19   : > { %s254_s9 = sshll.u32 %s1538_s28, 4  ;;  %s1539_s10 = smov [#allocation10]   ;;  %s255_s9 = int_to_ptr.vmem [resolvable:$true] %s254_s9 }
  0x1a   : > { %1141 = dma.hbm_to_vmem [thread:$0]  (!%p1650_p11), %s239_s11, 128, %s241_s14, [#allocation8]  }
  0x1b   : > { %s265_s13 = sshll.u32 %s1539_s10, 4  ;;  %s2195_s15 = smov 512   ;;  %s266_s13 = int_to_ptr.vmem [resolvable:$true] %s265_s13 }
  0x1c   : > { %s252_s17 = sshll.u32 %s2230_s2, 4  ;;  %s2196_s16 = smov 32   ;;  %s253_s17 = int_to_ptr.hbm [resolvable:$true] %s252_s17 }
  0x1d   : > { %s263_s27 = sshll.u32 %s2232_s3, 4  ;;  %s47_s11 = sadd.s32 1, %s1523_s23  ;;  %s264_s27 = int_to_ptr.hbm [resolvable:$true] %s263_s27 }
  0x1e   : > { %1144 = dma.hbm_to_vmem [thread:$0]  (!%p1650_p11), %s253_s17, 128, %s255_s9, [#allocation8]  }
  0x1f   : > { %1147 = dma.hbm_to_vmem [thread:$0]  (!%p1650_p11), %s264_s27, 8192, %s266_s13, [#allocation11], %s2195_s15, %s2195_s15, %s2196_s16  }
  0x20   : > { %s35_s14 = sadd.s32 1, %s1531_s25  ;;  %p54_p12 = scmp.ne.s32.totalorder %s1523_s23, %s1519_s22 }
  0x21   : > { %p36_p13 = scmp.ge.s32.totalorder %s35_s14, 2  ;;  %p55_p0 = scmp.eq.s32.totalorder %s1535_s26, 0 }
  0x22   : > { %p1673_p3 = por %p1619_p2, %p54_p12  ;;  %p1159_p5 = scmp.lt.s32.totalorder %s1535_s26, 2 }
  0x23   : > { %s2285_s14 = smov (%p36_p13, %s35_s14), 0  ;;  %p1680_p7 = por %p55_p0, %p54_p12 }
  0x24   : > { %2234 = sst [smem:[#allocation22_spill]] %s2285_s14  ;;  %s279_s19 = sand.u32 1, %s1523_s23  }
  0x25   : > { %s42_s20 = ssub.s32 %s1531_s25, %s2285_s14  ;;  %s1075_s27 = sshll.u32 %s279_s19, 7 }
  0x26   : > { %p45_p10 = scmp.eq.s32.totalorder %s42_s20, 0  ;;  %s1112_s28 = sshll.u32 %s1531_s25, 7 }
  0x27   : > { %s291_s15 = scalar_lea.hbm %s2188_s0, %s1112_s28  ;;  %s283_s16 = scalar_lea.vmem [#allocation4], %s1075_s27 }
  0x28   : > { %s1689_s9 = scalar_select %p45_p10, %s1523_s23, %s47_s11  }
  0x29   : > { %s294_s1 = sshll.u32 %s283_s16, 4  ;;  %s292_s2 = sshll.u32 %s291_s15, 4  ;;  %s295_s1 = int_to_ptr.vmem [resolvable:$true] %s294_s1  ;;  %s293_s2 = int_to_ptr.hbm [resolvable:$true] %s292_s2 }
  0x2a   : > { %p1149_p11 = pnand %p1159_p5, %p1680_p7  ;;  %s280_s3 = scalar_lea.sflag [#allocation5], %s279_s19 }
  0x2b   : > { %s2236_s8 = smov 32   ;;  %s2237_s14 = smov 512  }
  0x2c   : > { %1151 = dma.hbm_to_vmem [thread:$0]  (!%p1149_p11), %s293_s2, 2048, %s295_s1, %s280_s3, %s2237_s14, %s2237_s14, %s2236_s8  }
  0x2d   : > { %306 = sbr.rel (%p1638_p8) target bundleno = 753 (0x2f1), region = 36 }
  0x32   : > { %s1704_s11 = sand.u32 1, %s1519_s22  }
  0x33   : > { %s1080_s15 = sshll.u32 %s1704_s11, 7  ;;  %s309_s16 = scalar_lea.sflag [#allocation5], %s1704_s11 }
  0x34   : > { %s1708_s20 = scalar_lea.vmem [#allocation4], %s1080_s15 }
  0x35   : > { %1494 = dma.done.wait (%p1625_p4), %s309_s16, 2048  }
  0x36   : > { %1496 = vsyncadd (%p1625_p4), %s309_s16, 4294965248 }
  0x37   : > { %1498 = dma.done.wait (%p1615_p1), [#allocation8], 256  }
  0x38   : > { %1500 = vsyncadd (%p1615_p1), [#allocation8], 4294967040 }
  0x39   : > { %1502 = dma.done.wait (%p1615_p1), [#allocation11], 8192  }
  0x3a   : > { %1504 = vsyncadd (%p1615_p1), [#allocation11], 4294959104  ;;  %s1084_s1 = sshll.u32 %s1704_s11, 5  ;;  %p1085_p8 = scmp.ne.s32.totalorder %s1527_s24, 0 }
  0x3b   : > { %s1723_s2 = scalar_lea.vmem [#allocation12], %s1084_s1 }
  0x3c   : > { %362 = sbr.rel (%p1085_p8) target bundleno = 68 (0x44), region = 56 }
  0x41   : > { %v363_v0 = vld [vmem:[#allocation7] sm:$0xff]  ;;  %v365_v1 = vld [vmem:[#allocation9] sm:$0xff] }
  0x42   : > { %364 = vst [vmem:[#allocation2] sm:$0xff] %v363_v0 }
  0x43   : > { %366 = vst [vmem:[#allocation3] sm:$0xff] %v365_v1 }
  0x44 PF: > { %v1726_v2 = vld [vmem:[#allocation10 + $0x1e0] sm:$0xff]  ;;  %v1728_v3 = vld [vmem:[#allocation10 + $0x1e8] sm:$0xff]  ;;  %v1730_v4 = vld [vmem:[#allocation10 + $0x1f0] sm:$0xff]  ;;  %p1101_p1 = scmp.ne.s32.totalorder %s1527_s24, 1 }
  0x45   : > { %437 = vmatpush.msra.mxu0 %v1726_v2  ;;  %457 = vmatpush.msra.mxu1 %v1728_v3  ;;  %v1734_v5 = vld [vmem:[#allocation10 + $0x1c0] sm:$0xff]  ;;  %v1736_v6 = vld [vmem:[#allocation10 + $0x1c8] sm:$0xff]  ;;  %v1738_v7 = vld [vmem:[#allocation10 + $0x1d0] sm:$0xff] }
  0x46   : > { %477 = vmatpush.msra.mxu2 %v1730_v4  ;;  %v1741_v8 = vld [vmem:[#allocation10 + $0x1a0] sm:$0xff]  ;;  %v1743_v9 = vld [vmem:[#allocation10 + $0x1a8] sm:$0xff]  ;;  %v1747_v10 = vld [vmem:[#allocation10 + $0x1b0] sm:$0xff] }
  0x47   : > { %438 = vmatpush.msra.mxu0 %v1734_v5  ;;  %458 = vmatpush.msra.mxu1 %v1736_v6  ;;  %v1749_v11 = vld [vmem:[#allocation10 + $0x1f8] sm:$0xff]  ;;  %v1753_v12 = vld [vmem:[#allocation10 + $0x180] sm:$0xff]  ;;  %v1755_v13 = vld [vmem:[#allocation10 + $0x188] sm:$0xff] }
  0x48   : > { %478 = vmatpush.msra.mxu2 %v1738_v7  ;;  %497 = vmatpush.msra.mxu3 %v1749_v11  ;;  %v1757_v14 = vld [vmem:[#allocation10 + $0x1d8] sm:$0xff]  ;;  %v1761_v15 = vld [vmem:[#allocation10 + $0x190] sm:$0xff]  ;;  %v1767_v17 = vld [vmem:[#allocation10 + $0x160] sm:$0xff] }
  0x49   : > { %439 = vmatpush.msra.mxu0 %v1741_v8  ;;  %459 = vmatpush.msra.mxu1 %v1743_v9  ;;  %v1763_v16 = vld [vmem:[#allocation10 + $0x1b8] sm:$0xff]  ;;  %v1769_v18 = vld [vmem:[#allocation10 + $0x168] sm:$0xff]  ;;  %v1773_v19 = vld [vmem:[#allocation10 + $0x170] sm:$0xff] }
  0x4a   : > { %479 = vmatpush.msra.mxu2 %v1747_v10  ;;  %498 = vmatpush.msra.mxu3 %v1757_v14  ;;  %v1775_v20 = vld [vmem:[#allocation10 + $0x198] sm:$0xff]  ;;  %v1779_v21 = vld [vmem:[#allocation10 + $0x140] sm:$0xff]  ;;  %v1781_v22 = vld [vmem:[#allocation10 + $0x148] sm:$0xff] }
  0x4b   : > { %440 = vmatpush.msra.mxu0 %v1753_v12  ;;  %460 = vmatpush.msra.mxu1 %v1755_v13  ;;  %v1785_v23 = vld [vmem:[#allocation10 + $0x150] sm:$0xff]  ;;  %v1787_v24 = vld [vmem:[#allocation10 + $0x178] sm:$0xff]  ;;  %v1791_v25 = vld [vmem:[#allocation10 + $0x120] sm:$0xff] }
  0x4c   : > { %480 = vmatpush.msra.mxu2 %v1761_v15  ;;  %499 = vmatpush.msra.mxu3 %v1763_v16  ;;  %v1793_v26 = vld [vmem:[#allocation10 + $0x128] sm:$0xff]  ;;  %v1797_v27 = vld [vmem:[#allocation10 + $0x130] sm:$0xff]  ;;  %v1799_v28 = vld [vmem:[#allocation10 + $0x158] sm:$0xff] }
  0x4d   : > { %441 = vmatpush.msra.mxu0 %v1767_v17  ;;  %461 = vmatpush.msra.mxu1 %v1769_v18  ;;  %v1803_v29 = vld [vmem:[#allocation10 + $0x100] sm:$0xff]  ;;  %v1805_v30 = vld [vmem:[#allocation10 + $0x108] sm:$0xff]  ;;  %v1809_v31 = vld [vmem:[#allocation10 + $0x110] sm:$0xff] }
  0x4e   : > { %481 = vmatpush.msra.mxu2 %v1773_v19  ;;  %500 = vmatpush.msra.mxu3 %v1775_v20  ;;  %v1811_v32 = vld [vmem:[#allocation10 + $0x138] sm:$0xff]  ;;  %v1815_v33 = vld [vmem:[#allocation10 + $0xe0] sm:$0xff]  ;;  %v1817_v34 = vld [vmem:[#allocation10 + $0xe8] sm:$0xff] }
  0x4f   : > { %442 = vmatpush.msra.mxu0 %v1779_v21  ;;  %462 = vmatpush.msra.mxu1 %v1781_v22  ;;  %v1821_v35 = vld [vmem:[#allocation10 + $0xf0] sm:$0xff]  ;;  %v1823_v36 = vld [vmem:[#allocation10 + $0x118] sm:$0xff]  ;;  %v1827_v37 = vld [vmem:[#allocation10 + $0xc0] sm:$0xff] }
  0x50   : > { %482 = vmatpush.msra.mxu2 %v1785_v23  ;;  %501 = vmatpush.msra.mxu3 %v1787_v24  ;;  %v1829_v38 = vld [vmem:[#allocation10 + $0xc8] sm:$0xff]  ;;  %v1833_v39 = vld [vmem:[#allocation10 + $0xd0] sm:$0xff]  ;;  %v1835_v40 = vld [vmem:[#allocation10 + $0xf8] sm:$0xff] }
  0x51   : > { %443 = vmatpush.msra.mxu0 %v1791_v25  ;;  %463 = vmatpush.msra.mxu1 %v1793_v26  ;;  %v1839_v41 = vld [vmem:[#allocation10 + $0xa0] sm:$0xff]  ;;  %v1841_v42 = vld [vmem:[#allocation10 + $0xa8] sm:$0xff]  ;;  %v1845_v43 = vld [vmem:[#allocation10 + $0xb0] sm:$0xff] }
  0x52   : > { %483 = vmatpush.msra.mxu2 %v1797_v27  ;;  %502 = vmatpush.msra.mxu3 %v1799_v28  ;;  %v1847_v44 = vld [vmem:[#allocation10 + $0xd8] sm:$0xff]  ;;  %v1851_v45 = vld [vmem:[#allocation10 + $0x80] sm:$0xff]  ;;  %v1853_v46 = vld [vmem:[#allocation10 + $0x88] sm:$0xff] }
  0x53   : > { %444 = vmatpush.msra.mxu0 %v1803_v29  ;;  %464 = vmatpush.msra.mxu1 %v1805_v30  ;;  %2238 = vst [vmem:[#allocation23_spill] sm:$0xff] %v1853_v46  ;;  %v1857_v47 = vld [vmem:[#allocation10 + $0x90] sm:$0xff]  ;;  %v1859_v48 = vld [vmem:[#allocation10 + $0xb8] sm:$0xff]  ;;  %v1863_v49 = vld [vmem:[#allocation10 + $0x60] sm:$0xff] }
  0x54   : > { %484 = vmatpush.msra.mxu2 %v1809_v31  ;;  %503 = vmatpush.msra.mxu3 %v1811_v32  ;;  %2239 = vst [vmem:[#allocation24_spill] sm:$0xff] %v1857_v47  ;;  %v1865_v50 = vld [vmem:[#allocation10 + $0x68] sm:$0xff]  ;;  %v1869_v51 = vld [vmem:[#allocation10 + $0x70] sm:$0xff]  ;;  %v1871_v52 = vld [vmem:[#allocation10 + $0x98] sm:$0xff] }
  0x55   : > { %445 = vmatpush.msra.mxu0 %v1815_v33  ;;  %465 = vmatpush.msra.mxu1 %v1817_v34  ;;  %2240 = vst [vmem:[#allocation25_spill] sm:$0xff] %v1863_v49  ;;  %v1875_v53 = vld [vmem:[#allocation10 + $0x40] sm:$0xff]  ;;  %v1877_v54 = vld [vmem:[#allocation10 + $0x48] sm:$0xff]  ;;  %v1881_v55 = vld [vmem:[#allocation10 + $0x50] sm:$0xff] }
  0x56   : > { %485 = vmatpush.msra.mxu2 %v1821_v35  ;;  %504 = vmatpush.msra.mxu3 %v1823_v36  ;;  %2241 = vst [vmem:[#allocation26_spill] sm:$0xff] %v1865_v50  ;;  %v1883_v56 = vld [vmem:[#allocation10 + $0x78] sm:$0xff]  ;;  %v1887_v57 = vld [vmem:[#allocation10 + $0x20] sm:$0xff]  ;;  %v1889_v58 = vld [vmem:[#allocation10 + $0x28] sm:$0xff] }
  0x57   : > { %446 = vmatpush.msra.mxu0 %v1827_v37  ;;  %466 = vmatpush.msra.mxu1 %v1829_v38  ;;  %2242 = vst [vmem:[#allocation27_spill] sm:$0xff] %v1869_v51  ;;  %v1893_v59 = vld [vmem:[#allocation10 + $0x30] sm:$0xff]  ;;  %v1895_v60 = vld [vmem:[#allocation10 + $0x58] sm:$0xff]  ;;  %v1899_v61 = vld [vmem:[#allocation10] sm:$0xff] }
  0x58   : > { %486 = vmatpush.msra.mxu2 %v1833_v39  ;;  %505 = vmatpush.msra.mxu3 %v1835_v40  ;;  %2243 = vst [vmem:[#allocation28_spill] sm:$0xff] %v1871_v52  ;;  %v1901_v62 = vld [vmem:[#allocation10 + $0x8] sm:$0xff]  ;;  %v1905_v63 = vld [vmem:[#allocation10 + $0x10] sm:$0xff]  ;;  %v431_v0 = vld [vmem:[#allocation2] sm:$0xff] }
  0x59   : > { %447 = vmatpush.msra.mxu0 %v1839_v41  ;;  %467 = vmatpush.msra.mxu1 %v1841_v42  ;;  %2244 = vst [vmem:[#allocation29_spill] sm:$0xff] %v1875_v53  ;;  %v1911_v1 = vld [vmem:[#allocation10 + $0x38] sm:$0xff] }
  0x5a   : > { %487 = vmatpush.msra.mxu2 %v1845_v43  ;;  %506 = vmatpush.msra.mxu3 %v1847_v44  ;;  %2245 = vst [vmem:[#allocation30_spill] sm:$0xff] %v1877_v54 }
  0x5b   : > { %448 = vmatpush.msra.mxu0 %v1851_v45  ;;  %468 = vmatpush.msra.mxu1 %v1853_v46  ;;  %2246 = vst [vmem:[#allocation31_spill] sm:$0xff] %v1881_v55 }
  0x5c   : > { %488 = vmatpush.msra.mxu2 %v1857_v47  ;;  %507 = vmatpush.msra.mxu3 %v1859_v48  ;;  %2247 = vst [vmem:[#allocation32_spill] sm:$0xff] %v1883_v56 }
  0x5d   : > { %449 = vmatpush.msra.mxu0 %v1863_v49  ;;  %469 = vmatpush.msra.mxu1 %v1865_v50  ;;  %2248 = vst [vmem:[#allocation33_spill] sm:$0xff] %v1887_v57 }
  0x5e   : > { %489 = vmatpush.msra.mxu2 %v1869_v51  ;;  %508 = vmatpush.msra.mxu3 %v1871_v52  ;;  %2249 = vst [vmem:[#allocation34_spill] sm:$0xff] %v1889_v58 }
  0x5f   : > { %450 = vmatpush.msra.mxu0 %v1875_v53  ;;  %470 = vmatpush.msra.mxu1 %v1877_v54  ;;  %2250 = vst [vmem:[#allocation35_spill] sm:$0xff] %v1893_v59 }
  0x60   : > { %2251 = vst [vmem:[#allocation36_spill] sm:$0xff] %v1895_v60  ;;  %490 = vmatpush.msra.mxu2 %v1881_v55  ;;  %509 = vmatpush.msra.mxu3 %v1883_v56 }
  0x61   : > { %2252 = vst [vmem:[#allocation37_spill] sm:$0xff] %v1899_v61  ;;  %451 = vmatpush.msra.mxu0 %v1887_v57  ;;  %471 = vmatpush.msra.mxu1 %v1889_v58  ;;  %v1914_v57 = vld [vmem:[#allocation10 + $0x18] sm:$0xff] }
  0x62   : > { %2253 = vst [vmem:[#allocation38_spill] sm:$0xff] %v1901_v62  ;;  %491 = vmatpush.msra.mxu2 %v1893_v59  ;;  %510 = vmatpush.msra.mxu3 %v1895_v60 }
  0x63   : > { %2254 = vst [vmem:[#allocation39_spill] sm:$0xff] %v1905_v63  ;;  %452 = vmatpush.msra.mxu0 %v1899_v61  ;;  %472 = vmatpush.msra.mxu1 %v1901_v62 }
  0x64   : > { %2255 = vst [vmem:[#allocation40_spill] sm:$0xff] %v1911_v1  ;;  %492 = vmatpush.msra.mxu2 %v1905_v63  ;;  %453 = vmatmul.f32.vlgmr.msra.gmra.mxu0 %v431_v0 }
  0x65   : > { %473 = vmatmul.f32.vlgmr.msra.gmra.mxu1 %v431_v0  ;;  %493 = vmatmul.f32.vlgmr.msra.gmra.mxu2 %v431_v0  ;;  %2256 = vst [vmem:[#allocation41_spill] sm:$0xff] %v1914_v57 }
  0x66   : > { %511 = vmatpush.msra.mxu3 %v1911_v1  ;;  %545 = vmatpush.msrb.mxu0 %v1726_v2 }
  0x67   : > { %565 = vmatpush.msrb.mxu1 %v1728_v3  ;;  %585 = vmatpush.msrb.mxu2 %v1730_v4 }
  0x68   : > { %512 = vmatpush.msra.mxu3 %v1914_v57  ;;  %546 = vmatpush.msrb.mxu0 %v1734_v5 }
  0x69   : > { %513 = vmatmul.f32.vlgmr.msra.gmra.mxu3 %v431_v0  ;;  %566 = vmatpush.msrb.mxu1 %v1736_v6  ;;  %v2257_v0 = vld [vmem:[#allocation33_spill] sm:$0xff] }
  0x6a   : > { %605 = vmatpush.msrb.mxu3 %v1749_v11  ;;  %586 = vmatpush.msrb.mxu2 %v1738_v7 }
  0x6b   : > { %547 = vmatpush.msrb.mxu0 %v1741_v8  ;;  %567 = vmatpush.msrb.mxu1 %v1743_v9 }
  0x6c   : > { %606 = vmatpush.msrb.mxu3 %v1757_v14  ;;  %587 = vmatpush.msrb.mxu2 %v1747_v10 }
  0x6d   : > { %548 = vmatpush.msrb.mxu0 %v1753_v12  ;;  %568 = vmatpush.msrb.mxu1 %v1755_v13 }
  0x6e   : > { %607 = vmatpush.msrb.mxu3 %v1763_v16  ;;  %588 = vmatpush.msrb.mxu2 %v1761_v15 }
  0x6f   : > { %549 = vmatpush.msrb.mxu0 %v1767_v17  ;;  %569 = vmatpush.msrb.mxu1 %v1769_v18 }
  0x70   : > { %608 = vmatpush.msrb.mxu3 %v1775_v20  ;;  %589 = vmatpush.msrb.mxu2 %v1773_v19 }
  0x71   : > { %550 = vmatpush.msrb.mxu0 %v1779_v21  ;;  %570 = vmatpush.msrb.mxu1 %v1781_v22 }
  0x72   : > { %609 = vmatpush.msrb.mxu3 %v1787_v24  ;;  %590 = vmatpush.msrb.mxu2 %v1785_v23 }
  0x73   : > { %551 = vmatpush.msrb.mxu0 %v1791_v25  ;;  %571 = vmatpush.msrb.mxu1 %v1793_v26 }
  0x74   : > { %610 = vmatpush.msrb.mxu3 %v1799_v28  ;;  %591 = vmatpush.msrb.mxu2 %v1797_v27 }
  0x75   : > { %552 = vmatpush.msrb.mxu0 %v1803_v29  ;;  %572 = vmatpush.msrb.mxu1 %v1805_v30 }
  0x76   : > { %611 = vmatpush.msrb.mxu3 %v1811_v32  ;;  %592 = vmatpush.msrb.mxu2 %v1809_v31 }
  0x77   : > { %553 = vmatpush.msrb.mxu0 %v1815_v33  ;;  %573 = vmatpush.msrb.mxu1 %v1817_v34 }
  0x78   : > { %612 = vmatpush.msrb.mxu3 %v1823_v36  ;;  %593 = vmatpush.msrb.mxu2 %v1821_v35 }
  0x79   : > { %554 = vmatpush.msrb.mxu0 %v1827_v37  ;;  %574 = vmatpush.msrb.mxu1 %v1829_v38 }
  0x7a   : > { %613 = vmatpush.msrb.mxu3 %v1835_v40  ;;  %594 = vmatpush.msrb.mxu2 %v1833_v39 }
  0x7b   : > { %555 = vmatpush.msrb.mxu0 %v1839_v41  ;;  %575 = vmatpush.msrb.mxu1 %v1841_v42 }
  0x7c   : > { %614 = vmatpush.msrb.mxu3 %v1847_v44  ;;  %595 = vmatpush.msrb.mxu2 %v1845_v43 }
  0x7d   : > { %556 = vmatpush.msrb.mxu0 %v1851_v45  ;;  %576 = vmatpush.msrb.mxu1 %v1853_v46 }
  0x7e   : > { %615 = vmatpush.msrb.mxu3 %v1859_v48  ;;  %596 = vmatpush.msrb.mxu2 %v1857_v47 }
  0x7f   : > { %557 = vmatpush.msrb.mxu0 %v1863_v49  ;;  %577 = vmatpush.msrb.mxu1 %v1865_v50 }
  0x80   : > { %616 = vmatpush.msrb.mxu3 %v1871_v52  ;;  %597 = vmatpush.msrb.mxu2 %v1869_v51 }
  0x81   : > { %558 = vmatpush.msrb.mxu0 %v1875_v53  ;;  %578 = vmatpush.msrb.mxu1 %v1877_v54 }
  0x82   : > { %617 = vmatpush.msrb.mxu3 %v1883_v56  ;;  %598 = vmatpush.msrb.mxu2 %v1881_v55 }
  0x83   : > { %559 = vmatpush.msrb.mxu0 %v2257_v0  ;;  %579 = vmatpush.msrb.mxu1 %v1889_v58 }
  0x84   : > { %618 = vmatpush.msrb.mxu3 %v1895_v60  ;;  %599 = vmatpush.msrb.mxu2 %v1893_v59 }
  0x85   : > { %560 = vmatpush.msrb.mxu0 %v1899_v61  ;;  %580 = vmatpush.msrb.mxu1 %v1901_v62 }
  0x86   : > { %619 = vmatpush.msrb.mxu3 %v1911_v1  ;;  %600 = vmatpush.msrb.mxu2 %v1905_v63 }
  0x87   : > { %654 = vmatpush.msra.mxu0 %v1726_v2  ;;  %674 = vmatpush.msra.mxu1 %v1728_v3 }
  0x88   : > { %620 = vmatpush.msrb.mxu3 %v1914_v57  ;;  %694 = vmatpush.msra.mxu2 %v1730_v4 }
  0x89   : > { %655 = vmatpush.msra.mxu0 %v1734_v5  ;;  %675 = vmatpush.msra.mxu1 %v1736_v6 }
  0x8a   : > { %714 = vmatpush.msra.mxu3 %v1749_v11  ;;  %695 = vmatpush.msra.mxu2 %v1738_v7 }
  0x8b   : > { %656 = vmatpush.msra.mxu0 %v1741_v8  ;;  %676 = vmatpush.msra.mxu1 %v1743_v9 }
  0x8c   : > { %715 = vmatpush.msra.mxu3 %v1757_v14  ;;  %696 = vmatpush.msra.mxu2 %v1747_v10 }
  0x8d   : > { %657 = vmatpush.msra.mxu0 %v1753_v12  ;;  %677 = vmatpush.msra.mxu1 %v1755_v13 }
  0x8e   : > { %716 = vmatpush.msra.mxu3 %v1763_v16  ;;  %697 = vmatpush.msra.mxu2 %v1761_v15 }
  0x8f   : > { %658 = vmatpush.msra.mxu0 %v1767_v17  ;;  %678 = vmatpush.msra.mxu1 %v1769_v18 }
  0x90   : > { %717 = vmatpush.msra.mxu3 %v1775_v20  ;;  %698 = vmatpush.msra.mxu2 %v1773_v19 }
  0x91   : > { %659 = vmatpush.msra.mxu0 %v1779_v21  ;;  %679 = vmatpush.msra.mxu1 %v1781_v22 }
  0x92   : > { %718 = vmatpush.msra.mxu3 %v1787_v24  ;;  %699 = vmatpush.msra.mxu2 %v1785_v23 }
  0x93   : > { %660 = vmatpush.msra.mxu0 %v1791_v25  ;;  %680 = vmatpush.msra.mxu1 %v1793_v26 }
  0x94   : > { %719 = vmatpush.msra.mxu3 %v1799_v28  ;;  %700 = vmatpush.msra.mxu2 %v1797_v27 }
  0x95   : > { %661 = vmatpush.msra.mxu0 %v1803_v29  ;;  %681 = vmatpush.msra.mxu1 %v1805_v30 }
  0x96   : > { %720 = vmatpush.msra.mxu3 %v1811_v32  ;;  %701 = vmatpush.msra.mxu2 %v1809_v31 }
  0x97   : > { %662 = vmatpush.msra.mxu0 %v1815_v33  ;;  %682 = vmatpush.msra.mxu1 %v1817_v34 }
  0x98   : > { %721 = vmatpush.msra.mxu3 %v1823_v36  ;;  %702 = vmatpush.msra.mxu2 %v1821_v35 }
  0x99   : > { %663 = vmatpush.msra.mxu0 %v1827_v37  ;;  %683 = vmatpush.msra.mxu1 %v1829_v38 }
  0x9a   : > { %722 = vmatpush.msra.mxu3 %v1835_v40  ;;  %703 = vmatpush.msra.mxu2 %v1833_v39 }
  0x9b   : > { %664 = vmatpush.msra.mxu0 %v1839_v41  ;;  %684 = vmatpush.msra.mxu1 %v1841_v42 }
  0x9c   : > { %723 = vmatpush.msra.mxu3 %v1847_v44  ;;  %704 = vmatpush.msra.mxu2 %v1845_v43 }
  0x9d   : > { %665 = vmatpush.msra.mxu0 %v1851_v45  ;;  %685 = vmatpush.msra.mxu1 %v1853_v46 }
  0x9e   : > { %724 = vmatpush.msra.mxu3 %v1859_v48  ;;  %705 = vmatpush.msra.mxu2 %v1857_v47 }
  0x9f   : > { %666 = vmatpush.msra.mxu0 %v1863_v49  ;;  %686 = vmatpush.msra.mxu1 %v1865_v50  ;;  %v436_v50 = vld [vmem:[%s1708_s20 + $0x18] sm:$0xff] }
  0xa0   : > { %725 = vmatpush.msra.mxu3 %v1871_v52  ;;  %706 = vmatpush.msra.mxu2 %v1869_v51 }
  0xa1   : > { %667 = vmatpush.msra.mxu0 %v1875_v53  ;;  %687 = vmatpush.msra.mxu1 %v1877_v54 }
  0xa2   : > { %726 = vmatpush.msra.mxu3 %v1883_v56  ;;  %707 = vmatpush.msra.mxu2 %v1881_v55  ;;  %v433_v55 = vld [vmem:[%s1708_s20] sm:$0xff] }
  0xa3   : > { %668 = vmatpush.msra.mxu0 %v2257_v0  ;;  %688 = vmatpush.msra.mxu1 %v1889_v58 }
  0xa4   : > { %727 = vmatpush.msra.mxu3 %v1895_v60  ;;  %708 = vmatpush.msra.mxu2 %v1893_v59  ;;  %v434_v60 = vld [vmem:[%s1708_s20 + $0x8] sm:$0xff]  ;;  %v435_v59 = vld [vmem:[%s1708_s20 + $0x10] sm:$0xff] }
  0xa5   : > { %669 = vmatpush.msra.mxu0 %v1899_v61  ;;  %689 = vmatpush.msra.mxu1 %v1901_v62 }
  0xa6   : > { %728 = vmatpush.msra.mxu3 %v1911_v1  ;;  %709 = vmatpush.msra.mxu2 %v1905_v63 }
  0xa8   : > { %729 = vmatpush.msra.mxu3 %v1914_v57 }
  0xe1   : > { %v454_v54 = vpop.f32.mrf.mxu0 }
  0xe2   : > { %v517_v0 = vadd.f32 %v454_v54, %v433_v55  ;;  %v474_v53 = vpop.f32.mrf.mxu1  ;;  %v432_v54 = vld [vmem:[#allocation3] sm:$0xff] }
  0xe3   : > { %v518_v58 = vadd.f32 %v474_v53, %v434_v60 }
  0xe4   : > { %v521_v56 = vmul.f32 0.5, %v517_v0 }
  0xe5   : > { %v525_v51 = vmul.f32 0.5, %v518_v58 }
  0xe6   : > { %1225 = vtanh.f32 %v521_v56 }
  0xe7   : > { %1227 = vtanh.f32 %v525_v51 }
  0xe8   : > { %v494_v1 = vpop.f32.mrf.mxu2 }
  0xe9   : > { %v519_v61 = vadd.f32 %v494_v1, %v435_v59 }
  0xeb   : > { %1229 = vtanh.f32 %v519_v61 }
  0xec   : > { %v1226_v62 = vpop.eup %1225  ;;  %v514_v49 = vpop.f32.mrf.mxu3 }
  0xed   : > { %v1228_v63 = vpop.eup %1227  ;;  %v523_v52 = vmul.f32 0.5, %v1226_v62  ;;  %v520_v57 = vadd.f32 %v514_v49, %v436_v50 }
  0xee   : > { %v527_v47 = vmul.f32 0.5, %v1228_v63 }
  0xef   : > { %v524_v46 = vadd.f32 0.5, %v523_v52  ;;  %v530_v55 = vmul.f32 0.5, %v520_v57  ;;  %v1091_v52 = vld [vmem:[%s1708_s20 + $0x40] sm:$0xff]  ;;  %v1092_v57 = vld [vmem:[%s1708_s20 + $0x48] sm:$0xff] }
  0xf0   : > { %v528_v53 = vadd.f32 0.5, %v527_v47 }
  0xf1   : > { %v1230_v60 = vpop.eup %1229  ;;  %1231 = vtanh.f32 %v530_v55 }
  0xf2   : > { %v534_v56 = vmul.f32 %v528_v53, %v432_v54  ;;  %v535_v58 = vmul.f32 %v1230_v60, %v524_v46 }
  0xf4   : > { %v2050_v51 = vadd.f32 %v535_v58, %v534_v56  ;;  %v1093_v58 = vld [vmem:[%s1708_s20 + $0x50] sm:$0xff] }
  0xf6   : > { %1233 = vtanh.f32 %v2050_v51 }
  0xf7   : > { %v1232_v59 = vpop.eup %1231 }
  0xf8   : > { %v532_v61 = vmul.f32 0.5, %v1232_v59 }
  0xfa   : > { %v533_v1 = vadd.f32 0.5, %v532_v61 }
  0xfc   : > { %v1234_v0 = vpop.eup %1233 }
  0xfd   : > { %v538_v62 = vmul.f32 %v1234_v0, %v533_v1 }
  0xff   : > { %539 = vst [vmem:[%s1723_s2] sm:$0xff] %v538_v62  ;;  %561 = vmatmul.f32.vlgmr.msrb.gmra.mxu0 %v538_v62  ;;  %581 = vmatmul.f32.vlgmr.msrb.gmra.mxu1 %v538_v62 }
 0x100   : > { %601 = vmatmul.f32.vlgmr.msrb.gmra.mxu2 %v538_v62  ;;  %621 = vmatmul.f32.vlgmr.msrb.gmra.mxu3 %v538_v62 }
 0x101   : > { %763 = vmatpush.msrb.mxu0 %v1726_v2  ;;  %783 = vmatpush.msrb.mxu1 %v1728_v3  ;;  %v2258_v2 = vld [vmem:[#allocation23_spill] sm:$0xff]  ;;  %v2259_v3 = vld [vmem:[#allocation24_spill] sm:$0xff] }
 0x102   : > { %803 = vmatpush.msrb.mxu2 %v1730_v4  ;;  %823 = vmatpush.msrb.mxu3 %v1749_v11  ;;  %v2260_v4 = vld [vmem:[#allocation28_spill] sm:$0xff]  ;;  %v2267_v11 = vld [vmem:[#allocation31_spill] sm:$0xff] }
 0x103   : > { %764 = vmatpush.msrb.mxu0 %v1734_v5  ;;  %784 = vmatpush.msrb.mxu1 %v1736_v6  ;;  %v2261_v5 = vld [vmem:[#allocation25_spill] sm:$0xff]  ;;  %v2262_v6 = vld [vmem:[#allocation26_spill] sm:$0xff] }
 0x104   : > { %804 = vmatpush.msrb.mxu2 %v1738_v7  ;;  %824 = vmatpush.msrb.mxu3 %v1757_v14  ;;  %v2263_v7 = vld [vmem:[#allocation27_spill] sm:$0xff]  ;;  %v2270_v14 = vld [vmem:[#allocation34_spill] sm:$0xff] }
 0x105   : > { %765 = vmatpush.msrb.mxu0 %v1741_v8  ;;  %785 = vmatpush.msrb.mxu1 %v1743_v9  ;;  %v2264_v8 = vld [vmem:[#allocation32_spill] sm:$0xff]  ;;  %v2265_v9 = vld [vmem:[#allocation29_spill] sm:$0xff] }
 0x106   : > { %805 = vmatpush.msrb.mxu2 %v1747_v10  ;;  %825 = vmatpush.msrb.mxu3 %v1763_v16  ;;  %v2266_v10 = vld [vmem:[#allocation30_spill] sm:$0xff]  ;;  %v2272_v16 = vld [vmem:[#allocation40_spill] sm:$0xff] }
 0x107   : > { %766 = vmatpush.msrb.mxu0 %v1753_v12  ;;  %786 = vmatpush.msrb.mxu1 %v1755_v13  ;;  %v2268_v12 = vld [vmem:[#allocation36_spill] sm:$0xff]  ;;  %v2269_v13 = vld [vmem:[#allocation33_spill] sm:$0xff] }
 0x108   : > { %806 = vmatpush.msrb.mxu2 %v1761_v15  ;;  %826 = vmatpush.msrb.mxu3 %v1775_v20  ;;  %v2271_v15 = vld [vmem:[#allocation35_spill] sm:$0xff]  ;;  %v2276_v20 = vld [vmem:[#allocation41_spill] sm:$0xff] }
 0x109   : > { %767 = vmatpush.msrb.mxu0 %v1767_v17  ;;  %787 = vmatpush.msrb.mxu1 %v1769_v18  ;;  %v2273_v17 = vld [vmem:[#allocation37_spill] sm:$0xff]  ;;  %v2274_v18 = vld [vmem:[#allocation38_spill] sm:$0xff] }
 0x10a   : > { %807 = vmatpush.msrb.mxu2 %v1773_v19  ;;  %827 = vmatpush.msrb.mxu3 %v1787_v24  ;;  %v2275_v19 = vld [vmem:[#allocation39_spill] sm:$0xff] }
 0x10b   : > { %768 = vmatpush.msrb.mxu0 %v1779_v21  ;;  %788 = vmatpush.msrb.mxu1 %v1781_v22  ;;  %v1086_v21 = vld [vmem:[%s1708_s20 + $0x20] sm:$0xff]  ;;  %v1087_v22 = vld [vmem:[%s1708_s20 + $0x28] sm:$0xff] }
 0x10c   : > { %808 = vmatpush.msrb.mxu2 %v1785_v23  ;;  %828 = vmatpush.msrb.mxu3 %v1799_v28 }
 0x10d   : > { %769 = vmatpush.msrb.mxu0 %v1791_v25  ;;  %789 = vmatpush.msrb.mxu1 %v1793_v26 }
 0x10e   : > { %809 = vmatpush.msrb.mxu2 %v1797_v27  ;;  %829 = vmatpush.msrb.mxu3 %v1811_v32 }
 0x10f   : > { %770 = vmatpush.msrb.mxu0 %v1803_v29  ;;  %790 = vmatpush.msrb.mxu1 %v1805_v30  ;;  %v1088_v29 = vld [vmem:[%s1708_s20 + $0x30] sm:$0xff]  ;;  %v1089_v30 = vld [vmem:[%s1708_s20 + $0x38] sm:$0xff] }
 0x110   : > { %810 = vmatpush.msrb.mxu2 %v1809_v31  ;;  %830 = vmatpush.msrb.mxu3 %v1823_v36 }
 0x111   : > { %771 = vmatpush.msrb.mxu0 %v1815_v33  ;;  %791 = vmatpush.msrb.mxu1 %v1817_v34 }
 0x112   : > { %811 = vmatpush.msrb.mxu2 %v1821_v35  ;;  %831 = vmatpush.msrb.mxu3 %v1835_v40 }
 0x113   : > { %772 = vmatpush.msrb.mxu0 %v1827_v37  ;;  %792 = vmatpush.msrb.mxu1 %v1829_v38 }
 0x114   : > { %812 = vmatpush.msrb.mxu2 %v1833_v39  ;;  %832 = vmatpush.msrb.mxu3 %v1847_v44 }
 0x115   : > { %773 = vmatpush.msrb.mxu0 %v1839_v41  ;;  %793 = vmatpush.msrb.mxu1 %v1841_v42 }
 0x116   : > { %813 = vmatpush.msrb.mxu2 %v1845_v43  ;;  %833 = vmatpush.msrb.mxu3 %v1859_v48 }
 0x117   : > { %774 = vmatpush.msrb.mxu0 %v1851_v45  ;;  %794 = vmatpush.msrb.mxu1 %v2258_v2 }
 0x118   : > { %814 = vmatpush.msrb.mxu2 %v2259_v3  ;;  %834 = vmatpush.msrb.mxu3 %v2260_v4 }
 0x119   : > { %775 = vmatpush.msrb.mxu0 %v2261_v5  ;;  %795 = vmatpush.msrb.mxu1 %v2262_v6 }
 0x11a   : > { %815 = vmatpush.msrb.mxu2 %v2263_v7  ;;  %835 = vmatpush.msrb.mxu3 %v2264_v8 }
 0x11b   : > { %776 = vmatpush.msrb.mxu0 %v2265_v9  ;;  %796 = vmatpush.msrb.mxu1 %v2266_v10 }
 0x11c   : > { %816 = vmatpush.msrb.mxu2 %v2267_v11  ;;  %836 = vmatpush.msrb.mxu3 %v2268_v12 }
 0x11d   : > { %777 = vmatpush.msrb.mxu0 %v2269_v13  ;;  %797 = vmatpush.msrb.mxu1 %v2270_v14 }
 0x11e   : > { %817 = vmatpush.msrb.mxu2 %v2271_v15  ;;  %837 = vmatpush.msrb.mxu3 %v2272_v16 }
 0x11f   : > { %778 = vmatpush.msrb.mxu0 %v2273_v17  ;;  %798 = vmatpush.msrb.mxu1 %v2274_v18  ;;  %v1096_v17 = vld [vmem:[%s1708_s20 + $0x60] sm:$0xff]  ;;  %v1097_v18 = vld [vmem:[%s1708_s20 + $0x68] sm:$0xff] }
 0x120   : > { %818 = vmatpush.msrb.mxu2 %v2275_v19  ;;  %838 = vmatpush.msrb.mxu3 %v2276_v20 }
 0x17c   : > { %v562_v23 = vpop.f32.mrf.mxu0  ;;  %v582_v24 = vpop.f32.mrf.mxu1 }
 0x17d   : > { %v625_v25 = vadd.f32 %v1086_v21, %v562_v23  ;;  %v626_v26 = vadd.f32 %v1087_v22, %v582_v24 }
 0x17f   : > { %v629_v27 = vmul.f32 0.5, %v625_v25  ;;  %v633_v28 = vmul.f32 0.5, %v626_v26  ;;  %v1098_v25 = vld [vmem:[%s1708_s20 + $0x70] sm:$0xff]  ;;  %v1099_v26 = vld [vmem:[%s1708_s20 + $0x78] sm:$0xff] }
 0x181   : > { %1235 = vtanh.f32 %v629_v27 }
 0x182   : > { %1237 = vtanh.f32 %v633_v28 }
 0x183   : > { %v602_v31 = vpop.f32.mrf.mxu2  ;;  %v622_v32 = vpop.f32.mrf.mxu3 }
 0x184   : > { %v627_v33 = vadd.f32 %v1088_v29, %v602_v31  ;;  %v628_v34 = vadd.f32 %v1089_v30, %v622_v32 }
 0x186   : > { %1239 = vtanh.f32 %v627_v33  ;;  %v638_v35 = vmul.f32 0.5, %v628_v34 }
 0x187   : > { %v1236_v36 = vpop.eup %1235 }
 0x188   : > { %v1238_v37 = vpop.eup %1237  ;;  %v631_v38 = vmul.f32 0.5, %v1236_v36  ;;  %1241 = vtanh.f32 %v638_v35 }
 0x189   : > { %v635_v39 = vmul.f32 0.5, %v1238_v37 }
 0x18a   : > { %v632_v40 = vadd.f32 0.5, %v631_v38 }
 0x18b   : > { %v636_v41 = vadd.f32 0.5, %v635_v39 }
 0x18c   : > { %v1240_v42 = vpop.eup %1239 }
 0x18d   : > { %v642_v43 = vmul.f32 %v636_v41, %v2050_v51  ;;  %v643_v44 = vmul.f32 %v1240_v42, %v632_v40  ;;  %v1094_v51 = vld [vmem:[%s1708_s20 + $0x58] sm:$0xff] }
 0x18e   : > { %v1242_v45 = vpop.eup %1241 }
 0x18f   : > { %v644_v46 = vadd.f32 %v643_v44, %v642_v43  ;;  %v640_v47 = vmul.f32 0.5, %v1242_v45 }
 0x191   : > { %1243 = vtanh.f32 %v644_v46  ;;  %v641_v48 = vadd.f32 0.5, %v640_v47 }
 0x197   : > { %v1244_v49 = vpop.eup %1243 }
 0x198   : > { %v646_v50 = vmul.f32 %v1244_v49, %v641_v48 }
 0x19a   : > { %1090 = vst [vmem:[%s1723_s2 + $0x8] sm:$0xff] %v646_v50  ;;  %670 = vmatmul.f32.vlgmr.msra.gmra.mxu0 %v646_v50  ;;  %690 = vmatmul.f32.vlgmr.msra.gmra.mxu1 %v646_v50 }
 0x19b   : > { %710 = vmatmul.f32.vlgmr.msra.gmra.mxu2 %v646_v50  ;;  %730 = vmatmul.f32.vlgmr.msra.gmra.mxu3 %v646_v50 }
 0x217   : > { %v671_v63 = vpop.f32.mrf.mxu0  ;;  %v691_v54 = vpop.f32.mrf.mxu1 }
 0x218   : > { %v734_v55 = vadd.f32 %v1091_v52, %v671_v63  ;;  %v735_v53 = vadd.f32 %v1092_v57, %v691_v54 }
 0x21a   : > { %v738_v60 = vmul.f32 0.5, %v734_v55  ;;  %v742_v56 = vmul.f32 0.5, %v735_v53 }
 0x21c   : > { %1245 = vtanh.f32 %v738_v60 }
 0x21d   : > { %1247 = vtanh.f32 %v742_v56 }
 0x21e   : > { %v711_v59 = vpop.f32.mrf.mxu2  ;;  %v731_v61 = vpop.f32.mrf.mxu3 }
 0x21f   : > { %v736_v1 = vadd.f32 %v1093_v58, %v711_v59  ;;  %v737_v0 = vadd.f32 %v1094_v51, %v731_v61 }
 0x221   : > { %1249 = vtanh.f32 %v736_v1  ;;  %v747_v62 = vmul.f32 0.5, %v737_v0 }
 0x222   : > { %v1246_v2 = vpop.eup %1245 }
 0x223   : > { %v1248_v3 = vpop.eup %1247  ;;  %v740_v4 = vmul.f32 0.5, %v1246_v2  ;;  %1251 = vtanh.f32 %v747_v62 }
 0x224   : > { %v744_v5 = vmul.f32 0.5, %v1248_v3 }
 0x225   : > { %v741_v6 = vadd.f32 0.5, %v740_v4 }
 0x226   : > { %v745_v7 = vadd.f32 0.5, %v744_v5 }
 0x227   : > { %v1250_v8 = vpop.eup %1249 }
 0x228   : > { %v751_v9 = vmul.f32 %v745_v7, %v644_v46  ;;  %v752_v10 = vmul.f32 %v1250_v8, %v741_v6 }
 0x229   : > { %v1252_v11 = vpop.eup %1251 }
 0x22a   : > { %v753_v12 = vadd.f32 %v752_v10, %v751_v9  ;;  %v749_v13 = vmul.f32 0.5, %v1252_v11 }
 0x22c   : > { %1253 = vtanh.f32 %v753_v12  ;;  %v750_v14 = vadd.f32 0.5, %v749_v13 }
 0x232   : > { %v1254_v15 = vpop.eup %1253 }
 0x233   : > { %v755_v16 = vmul.f32 %v1254_v15, %v750_v14 }
 0x235   : > { %1095 = vst [vmem:[%s1723_s2 + $0x10] sm:$0xff] %v755_v16  ;;  %779 = vmatmul.f32.vlgmr.msrb.gmra.mxu0 %v755_v16  ;;  %799 = vmatmul.f32.vlgmr.msrb.gmra.mxu1 %v755_v16 }
 0x236   : > { %819 = vmatmul.f32.vlgmr.msrb.gmra.mxu2 %v755_v16  ;;  %839 = vmatmul.f32.vlgmr.msrb.gmra.mxu3 %v755_v16 }
 0x2b2   : > { %v780_v19 = vpop.f32.mrf.mxu0  ;;  %v800_v20 = vpop.f32.mrf.mxu1 }
 0x2b3   : > { %v843_v21 = vadd.f32 %v1096_v17, %v780_v19  ;;  %v844_v22 = vadd.f32 %v1097_v18, %v800_v20 }
 0x2b5   : > { %v847_v23 = vmul.f32 0.5, %v843_v21  ;;  %v851_v24 = vmul.f32 0.5, %v844_v22 }
 0x2b7   : > { %1255 = vtanh.f32 %v847_v23 }
 0x2b8   : > { %1257 = vtanh.f32 %v851_v24 }
 0x2b9   : > { %v820_v27 = vpop.f32.mrf.mxu2  ;;  %v840_v28 = vpop.f32.mrf.mxu3 }
 0x2ba   : > { %v845_v29 = vadd.f32 %v1098_v25, %v820_v27  ;;  %v846_v30 = vadd.f32 %v1099_v26, %v840_v28 }
 0x2bc   : > { %1259 = vtanh.f32 %v845_v29  ;;  %v856_v31 = vmul.f32 0.5, %v846_v30 }
 0x2bd   : > { %v1256_v32 = vpop.eup %1255 }
 0x2be   : > { %v1258_v33 = vpop.eup %1257  ;;  %v849_v34 = vmul.f32 0.5, %v1256_v32  ;;  %1261 = vtanh.f32 %v856_v31 }
 0x2bf   : > { %v853_v35 = vmul.f32 0.5, %v1258_v33 }
 0x2c0   : > { %v850_v36 = vadd.f32 0.5, %v849_v34 }
 0x2c1   : > { %v854_v37 = vadd.f32 0.5, %v853_v35 }
 0x2c2   : > { %v1260_v38 = vpop.eup %1259 }
 0x2c3   : > { %v860_v39 = vmul.f32 %v854_v37, %v753_v12  ;;  %v861_v40 = vmul.f32 %v1260_v38, %v850_v36 }
 0x2c4   : > { %v1262_v41 = vpop.eup %1261 }
 0x2c5   : > { %v862_v42 = vadd.f32 %v861_v40, %v860_v39  ;;  %v858_v43 = vmul.f32 0.5, %v1262_v41 }
 0x2c7   : > { %1263 = vtanh.f32 %v862_v42  ;;  %868 = vst [vmem:[#allocation3] sm:$0xff] %v862_v42  ;;  %v859_v44 = vadd.f32 0.5, %v858_v43 }
 0x2cd   : > { %v1264_v45 = vpop.eup %1263  ;;  %872 = sbr.rel (%p1101_p1) target bundleno = 730 (0x2da), region = 60 }
 0x2ce   : > { %v864_v46 = vmul.f32 %v1264_v45, %v859_v44 }
 0x2d0   : > { %1100 = vst [vmem:[%s1723_s2 + $0x18] sm:$0xff] %v864_v46 }
 0x2d1   : > { %867 = vst [vmem:[#allocation2] sm:$0xff] %v864_v46 }
 0x2d2   : > { %v875_v48 = vld [vmem:[#allocation3] sm:$0xff] }
 0x2d3   : > { %876 = vst [vmem:[#allocation15] sm:$0xff] %v875_v48 }
 0x2d8   : > { %v873_v47 = vld [vmem:[#allocation2] sm:$0xff] }
 0x2d9   : > { %874 = vst [vmem:[#allocation13] sm:$0xff] %v873_v47 }
 0x2da PF: > { %s1542_s3 = smov [#allocation13]   ;;  %s910_s12 = sshll.u32 %s2193_s5, 4  ;;  %s911_s12 = int_to_ptr.hbm [resolvable:$true] %s910_s12 }
 0x2db   : > { %s908_s29 = sshll.u32 %s1542_s3, 4  ;;  %s1113_s14 = sshll.u32 %s1527_s24, 5  ;;  %s909_s29 = int_to_ptr.vmem [resolvable:$true] %s908_s29 }
 0x2dc   : > { %1130 = dma.vmem_to_hbm [thread:$0]  (%p1619_p2), %s909_s29, 128, %s911_s12, [#allocation14]  }
 0x2dd   : > { %s890_s27 = scalar_lea.hbm %s2192_s4, %s1113_s14  ;;  %s891_s28 = sshll.u32 %s1723_s2, 4  ;;  %s892_s28 = int_to_ptr.vmem [resolvable:$true] %s891_s28 }
 0x2de   : > { %s893_s10 = sshll.u32 %s890_s27, 4  ;;  %s878_s13 = scalar_lea.sflag [#allocation6], %s1704_s11  ;;  %s894_s10 = int_to_ptr.hbm [resolvable:$true] %s893_s10 }
 0x2df   : > { %s1427_s15 = sshra.s32 %s894_s10, 4  ;;  %s1433_s24 = scalar_lea.hbm %s2192_s4, 64  ;;  %s1428_s15 = int_to_ptr.hbm [resolvable:$true] %s1427_s15 }
 0x2e0   : > { %s1429_s16 = scalar_lea.hbm %s1428_s15, 32  ;;  %p1434_p0 = scmp.lt.s32.totalorder %s1428_s15, %s2192_s4 }
 0x2e1   : > { %p1430_p4 = scmp.ne.s32.totalorder %s1428_s15, %s1429_s16  ;;  %p1435_p5 = scmp.lt.s32.totalorder %s1433_s24, %s1429_s16 }
 0x2e3   : > { %p1431_p12 = pnand %p1430_p4, %p1673_p3  ;;  %p1436_p7 = por %p1435_p5, %p1434_p0 }
 0x2e5   : > { %p1432_p13 = pneg %p1431_p12 }
 0x2e7   : > { %p1437_p10 = pnand %p1436_p7, %p1432_p13 }
 0x2e9   : > { %1440 = shalt.err (!%p1437_p10)
}
 0x2ea   : > { %s1543_s11 = smov 128   ;;  %s1544_s2 = smov 8  }
 0x2eb   : > { %1128 = dma.vmem_to_hbm [thread:$0]  (%p1673_p3), %s892_s28, 512, %s894_s10, %s878_s13, %s1543_s11, %s1543_s11, %s1544_s2  }
 0x2ec   : > { %s1545_s7 = smov [#allocation15]   ;;  %s924_s18 = sshll.u32 %s2194_s6, 4  ;;  %s925_s18 = int_to_ptr.hbm [resolvable:$true] %s924_s18 }
 0x2ed   : > { %s922_s8 = sshll.u32 %s1545_s7, 4  ;;  %s923_s8 = int_to_ptr.vmem [resolvable:$true] %s922_s8 }
 0x2ee   : > { %1132 = dma.vmem_to_hbm [thread:$0]  (%p1619_p2), %s923_s8, 128, %s925_s18, [#allocation14]  }
 0x2ef   : > { %1506 = dma.done.wait (%p1619_p2), [#allocation14], 256  }
 0x2f0   : > { %1508 = vsyncadd (%p1619_p2), [#allocation14], 4294967040 }
 0x2f1 PF: > { %s946_s17 = sand.u32 1, %s1515_s21   ;;  %p1153_p3 = pnand %p1074_p9, %p1630_p6 }
 0x2f2   : > { %s947_s27 = scalar_lea.sflag [#allocation6], %s946_s17 }
 0x2f3   : > { %p1154_p11 = pneg %p1153_p3 }
 0x2f5   : > { %1510 = dma.done.wait (%p1154_p11), %s947_s27, 512  }
 0x2f6   : > { %1512 = vsyncadd (%p1154_p11), %s947_s27, 4294966784  ;;  %s26_s26 = sadd.s32 1, %s1535_s26   ;;  %s2278_s30 = sld [smem:[#allocation22_spill]] }
 0x2f7   : > { %p23_p8 = scmp.ge.s32.totalorder %s26_s26, 4   ;;  %s2279_s21 = smov %s1519_s22 }
 0x2f8   : > { %s2280_s22 = smov %s1523_s23  ;;  %s2281_s23 = smov %s1689_s9 }
 0x2f9   : > { %s2282_s24 = smov %s1531_s25  ;;  %25 = sbr.rel (!%p23_p8) target bundleno = 13 (0xd), region = 127 }
 0x2fc   : > { %s2283_s25 = smov %s2278_s30 }
 0x2fe   :  { %953 = vsyncpa [#allocation5], 1 }
 0x2ff   :  { %955 = vsyncpa [#allocation5 + $0x1], 1 }
 0x300   :  { %956 = vsyncpa [#allocation8], 1 }
 0x301   :  { %957 = vsyncpa [#allocation11], 1 }
 0x302   :  { %958 = vsyncpa [#allocation6], 1 }
 0x303   :  { %960 = vsyncpa [#allocation6 + $0x1], 1 }
 0x304   :  { %961 = vsyncpa [#allocation14], 1 }

</bundles_post_ra>
